<compile_context>
chip_gen: v6e
topology: v6e:2x2x1
jax: 0.10.0
libtpu: 0.0.40
codegen_flags: <defaults>
</compile_context>

<pallas_src>
import math

import jax
import jax.numpy as jnp
import numpy as np
from jax.experimental import pallas as pl
from jax.experimental.pallas import tpu as pltpu


def _make_mha_kernel(head, q_k_size, v_size, compute_dtype):
    H, Dk, Dv = head, q_k_size, v_size
    HDk = H * Dk

    def kernel(xq_ref, xkv_ref, mask_ref, wq_ref, bq_ref, wkv_ref, bkv_ref,
               o_ref, kv_ref):
        # --- fused K|V projection: depends only on the batch index, so it is
        # computed once per batch (first Lq tile) and cached in VMEM scratch.
        @pl.when(pl.program_id(1) == 0)
        def _():
            kv = jnp.dot(xkv_ref[0], wkv_ref[...],
                         preferred_element_type=jnp.float32) + bkv_ref[...]
            kv_ref[...] = kv.astype(kv_ref.dtype)       # (Lk, H*Dk + H*Dv)

        # Fused-over-heads Q projection; 1/sqrt(Dk) folded into wq/bq.
        q = (jnp.dot(xq_ref[0], wq_ref[...],
                     preferred_element_type=jnp.float32) + bq_ref[...]
             ).astype(compute_dtype)                     # (TLq, H*Dk)

        # int8 mask decoded once per step (integer compare, no f32 cast),
        # shared across all heads.
        masked = mask_ref[0].astype(jnp.int32) != 0      # (TLq, Lk) bool
        neg = jnp.float32(-1.0e9)

        kv = kv_ref[...]                                 # (Lk, H*Dk + H*Dv)
        for h in range(H):  # static, unrolled (H small)
            q_h = q[:, h * Dk:(h + 1) * Dk]              # (TLq, Dk)
            k_h = kv[:, h * Dk:(h + 1) * Dk]             # (Lk, Dk)
            v_h = kv[:, HDk + h * Dv: HDk + (h + 1) * Dv]  # (Lk, Dv)

            # scores = (q_scaled) @ k^T   (f32 accumulation)
            s = jax.lax.dot_general(q_h, k_h, (((1,), (1,)), ((), ())),
                                    preferred_element_type=jnp.float32)
            s = jnp.where(masked, neg, s)                # masked_fill(-1e9)

            # softmax in f32; normalization deferred past p@v.
            m = jnp.max(s, axis=-1, keepdims=True)
            e = jnp.exp(s - m)
            l = jnp.sum(e, axis=-1, keepdims=True)       # (TLq, 1)

            z_h = jnp.dot(e.astype(compute_dtype), v_h,
                          preferred_element_type=jnp.float32)   # (TLq, Dv)
            z_h = z_h * pl.reciprocal(l, approx=True)    # EUP reciprocal

            # write directly at the head's static column offset — output is
            # already in its final (B, Lq, H*Dv) layout.
            o_ref[0, :, h * Dv:(h + 1) * Dv] = z_h.astype(o_ref.dtype)

    return kernel


def _pick_lq_tile(Lq, preferred=512):
    if Lq <= preferred:
        return Lq
    for t in (preferred, 256, 128, 64, 32, 16, 8):
        if Lq % t == 0:
            return t
    # TODO(synk): pad Lq to a multiple of 8 instead of one huge full tile.
    return Lq


def _vmem_limit_bytes():
    # ~75% of physical VMEM, capped: ~96 MiB on v5e/v6e (128 MiB physical),
    # ~48 MiB on v7x (64 MiB physical).  Conservative fallback if the query
    # is unavailable.
    try:
        cap = pltpu.get_tpu_info().vmem_capacity_bytes
        return int(min(cap * 3 // 4, 100 * 1024 * 1024))
    except Exception:
        return 48 * 1024 * 1024


def multi_head_attention(x_q, x_kv, attn_mask, params, head, q_k_size, v_size,
                         compute_dtype=jnp.bfloat16):
    """params: dict with torch-layout weights:
         wq,(H*Dk,E)  bq,(H*Dk,)  wk,(H*Dk,E)  bk,(H*Dk,)  wv,(H*Dv,E)  bv,(H*Dv,)
    """
    B, Lq, E = x_q.shape
    _, Lk, _ = x_kv.shape
    H, Dk, Dv = head, q_k_size, v_size
    HDk, HDv = H * Dk, H * Dv

    scale = jnp.float32(1.0 / math.sqrt(Dk))

    # torch: y = x @ W.T + b ; the per-head split is head-major on the output
    # dim, so W.T is already in the right column order.  Fold 1/sqrt(Dk) into
    # the Q projection; fuse K and V into one projection.  Matmul operands go
    # to `compute_dtype` (bf16 by default); biases stay f32.
    wq = (params["wq"].astype(jnp.float32).T * scale).astype(compute_dtype)   # (E, H*Dk)
    bq = (params["bq"].astype(jnp.float32) * scale).reshape(1, HDk)           # (1, H*Dk) f32
    wkv = jnp.concatenate([params["wk"].T, params["wv"].T],
                          axis=1).astype(compute_dtype)                       # (E, HDk+HDv)
    bkv = jnp.concatenate([params["bk"], params["bv"]]
                          ).reshape(1, HDk + HDv).astype(jnp.float32)         # (1, HDk+HDv)

    xq_c = x_q.astype(compute_dtype)
    xkv_c = x_kv.astype(compute_dtype)
    mask_i8 = attn_mask.astype(jnp.int8)   # 4x less HBM/VMEM than int32

    TLq = _pick_lq_tile(Lq)
    grid = (B, Lq // TLq)
    kernel = _make_mha_kernel(H, Dk, Dv, compute_dtype)

    def build(single_buffer_weights):
        if single_buffer_weights:
            # grid-invariant streams: one VMEM copy is enough.
            def wspec(shape):
                return pl.BlockSpec(shape, lambda b, i: (0, 0),
                                    pipeline_mode=pl.Buffered(1))
        else:
            def wspec(shape):
                return pl.BlockSpec(shape, lambda b, i: (0, 0))

        return pl.pallas_call(
            kernel,
            out_shape=jax.ShapeDtypeStruct((B, Lq, HDv), jnp.float32),
            grid_spec=pltpu.PrefetchScalarGridSpec(
                num_scalar_prefetch=0,
                grid=grid,
                in_specs=[
                    pl.BlockSpec((1, TLq, E), lambda b, i: (b, i, 0)),       # x_q tile
                    pl.BlockSpec((1, Lk, E), lambda b, i: (b, 0, 0)),        # x_kv (full Lk)
                    pl.BlockSpec((1, TLq, Lk), lambda b, i: (b, i, 0)),      # mask (int8)
                    wspec((E, HDk)),                                         # wq (scaled)
                    wspec((1, HDk)),                                         # bq (scaled, f32)
                    wspec((E, HDk + HDv)),                                   # wkv (fused K|V)
                    wspec((1, HDk + HDv)),                                   # bkv (f32)
                ],
                out_specs=pl.BlockSpec((1, TLq, HDv), lambda b, i: (b, i, 0)),
                scratch_shapes=[pltpu.VMEM((Lk, HDk + HDv), compute_dtype)],  # cached K|V
            ),
            compiler_params=pltpu.CompilerParams(
                # KV scratch is reused across the Lq-tile axis -> "arbitrary";
                # B stays "parallel" for dual-TC sharding on v7x.
                dimension_semantics=("parallel", "arbitrary"),
                vmem_limit_bytes=_vmem_limit_bytes(),
            ),
        )

    args = (xq_c, xkv_c, mask_i8, wq, bq, wkv, bkv)
    try:
        z = build(True)(*args)
    except Exception:
        # pipeline_mode=pl.Buffered(1) not available on this jax version;
        # fall back to default (double-buffered) weight streams.
        z = build(False)(*args)
    return z  # already (B, Lq, H*Dv) — no transpose/reshape needed


def reference_mha(x_q, x_kv, attn_mask, params, head, q_k_size, v_size):
    """Pure-JAX f32 reference mirroring the torch forward (default branch)."""
    B, Lq, E = x_q.shape
    _, Lk, _ = x_kv.shape
    q = x_q @ params["wq"].T + params["bq"]
    k = x_kv @ params["wk"].T + params["bk"]
    v = x_kv @ params["wv"].T + params["bv"]
    q = q.reshape(B, Lq, head, q_k_size).transpose(0, 2, 1, 3)
    k = k.reshape(B, Lk, head, q_k_size).transpose(0, 2, 3, 1)
    attn = jnp.matmul(q, k) / math.sqrt(q_k_size)
    attn = jnp.where(attn_mask[:, None, :, :], -1.0e9, attn)
    attn = jax.nn.softmax(attn, axis=-1)
    v = v.reshape(B, Lk, head, v_size).transpose(0, 2, 1, 3)
    z = jnp.matmul(attn, v)
    z = z.transpose(0, 2, 1, 3)
    return z.reshape(B, Lq, head * v_size)


if __name__ == "__main__":
    # Small shapes consistent with the module's forward.
    B, Lq, Lk = 2, 8, 8
    emb_size, q_k_size, v_size, head = 32, 16, 16, 4

    key = jax.random.PRNGKey(0)
    k_xq, k_xkv, k_wq, k_bq, k_wk, k_bk, k_wv, k_bv = jax.random.split(key, 8)

    def _bf16_representable(a):
        # keep inputs exactly representable in bf16 so the f32 reference and
        # the bf16-compute kernel see identical operands (isolates kernel
        # rounding from input quantization in the correctness check).
        return a.astype(jnp.bfloat16).astype(jnp.float32)

    x_q = _bf16_representable(
        jax.random.normal(k_xq, (B, Lq, emb_size), dtype=jnp.float32))
    x_kv = _bf16_representable(
        jax.random.normal(k_xkv, (B, Lk, emb_size), dtype=jnp.float32))

    # boolean mask, True = masked (causal-style mask)
    row = jnp.arange(Lq)[:, None]
    col = jnp.arange(Lk)[None, :]
    attn_mask = jnp.broadcast_to(col > row, (B, Lq, Lk))

    bound = 1.0 / math.sqrt(emb_size)
    def _u(k, shape):
        return _bf16_representable(
            jax.random.uniform(k, shape, minval=-bound, maxval=bound,
                               dtype=jnp.float32))
    params = {
        "wq": _u(k_wq, (head * q_k_size, emb_size)),
        "bq": _u(k_bq, (head * q_k_size,)),
        "wk": _u(k_wk, (head * q_k_size, emb_size)),
        "bk": _u(k_bk, (head * q_k_size,)),
        "wv": _u(k_wv, (head * v_size, emb_size)),
        "bv": _u(k_bv, (head * v_size,)),
    }

    z = multi_head_attention(x_q, x_kv, attn_mask, params, head,
                             q_k_size, v_size)
    z = jax.block_until_ready(z)

    z_ref = reference_mha(x_q, x_kv, attn_mask, params, head, q_k_size, v_size)
    np.testing.assert_allclose(np.asarray(z), np.asarray(z_ref),
                               rtol=2e-2, atol=2e-2)

    print("KERNEL_OK")
</pallas_src>

<mosaic_0001>
module attributes {stable_mosaic.version = 11 : i64} {
  func.func @kernel(%arg0: i32, %arg1: i32, %arg2: memref<1x8x32xbf16, #tpu.memory_space<vmem>>, %arg3: memref<1x8x32xbf16, #tpu.memory_space<vmem>>, %arg4: memref<1x8x8xi8, #tpu.memory_space<vmem>>, %arg5: memref<32x64xbf16, #tpu.memory_space<vmem>>, %arg6: memref<1x64xf32, #tpu.memory_space<vmem>>, %arg7: memref<32x128xbf16, #tpu.memory_space<vmem>>, %arg8: memref<1x128xf32, #tpu.memory_space<vmem>>, %arg9: memref<1x8x64xf32, #tpu.memory_space<vmem>>, %arg10: memref<8x128xbf16, #tpu.memory_space<vmem>>) attributes {dimension_semantics = [#tpu.dimension_semantics<parallel>, #tpu.dimension_semantics<arbitrary>], iteration_bounds = array<i64: 2, 1>, scalar_prefetch = 0 : i64, scratch_operands = 1 : i64, tpu.core_type = #tpu.core_type<tc>, window_params = [{transform_indices = @transform_0, window_bounds = array<i64: 1, 8, 32>}, {transform_indices = @transform_1, window_bounds = array<i64: 1, 8, 32>}, {transform_indices = @transform_2, window_bounds = array<i64: 1, 8, 8>}, {pipeline_mode = #tpu.pipeline_mode<synchronous>, transform_indices = @transform_3, window_bounds = array<i64: 32, 64>}, {pipeline_mode = #tpu.pipeline_mode<synchronous>, transform_indices = @transform_4, window_bounds = array<i64: 1, 64>}, {pipeline_mode = #tpu.pipeline_mode<synchronous>, transform_indices = @transform_5, window_bounds = array<i64: 32, 128>}, {pipeline_mode = #tpu.pipeline_mode<synchronous>, transform_indices = @transform_6, window_bounds = array<i64: 1, 128>}, {transform_indices = @transform_7, window_bounds = array<i64: 1, 8, 64>}]} {
    %c0_i32 = arith.constant 0 : i32
    %0 = arith.cmpi eq, %arg1, %c0_i32 : i32
    %1 = arith.extui %0 : i1 to i32
    %c0_i32_0 = arith.constant 0 : i32
    %2 = arith.cmpi ne, %1, %c0_i32_0 : i32
    scf.if %2 {
      %c0_42 = arith.constant 0 : index
      %c0_43 = arith.constant 0 : index
      %c0_44 = arith.constant 0 : index
      %101 = vector.load %arg3[%c0_42, %c0_43, %c0_44] : memref<1x8x32xbf16, #tpu.memory_space<vmem>>, vector<1x8x32xbf16>
      %102 = vector.shape_cast %101 : vector<1x8x32xbf16> to vector<8x32xbf16>
      %c0_45 = arith.constant 0 : index
      %c0_46 = arith.constant 0 : index
      %103 = vector.load %arg7[%c0_45, %c0_46] : memref<32x128xbf16, #tpu.memory_space<vmem>>, vector<32x128xbf16>
      %cst_47 = arith.constant dense<0.000000e+00> : vector<8x128xf32>
      %104 = tpu.matmul %102, %103, %cst_47 {dimension_numbers = #tpu.dot_dimension_numbers<[1], [0], [0], [1], [0, 0, 1, 1], [], []>} : vector<8x32xbf16>, vector<32x128xbf16>, vector<8x128xf32> -> vector<8x128xf32>
      %c0_48 = arith.constant 0 : index
      %c0_49 = arith.constant 0 : index
      %105 = vector.load %arg8[%c0_48, %c0_49] : memref<1x128xf32, #tpu.memory_space<vmem>>, vector<1x128xf32>
      %106 = vector.broadcast %105 : vector<1x128xf32> to vector<8x128xf32>
      %107 = arith.addf %104, %106 : vector<8x128xf32>
      %108 = arith.truncf %107 : vector<8x128xf32> to vector<8x128xbf16>
      %c0_50 = arith.constant 0 : index
      %c0_51 = arith.constant 0 : index
      %109 = vector.load %arg10[%c0_50, %c0_51] : memref<8x128xbf16, #tpu.memory_space<vmem>>, vector<8x128xbf16>
      tpu.vector_store %arg10[%c0_50, %c0_51], %108 {strides = array<i32>} : memref<8x128xbf16, #tpu.memory_space<vmem>>, vector<8x128xbf16>,
    } else {
    }
    %c0 = arith.constant 0 : index
    %c0_1 = arith.constant 0 : index
    %c0_2 = arith.constant 0 : index
    %3 = vector.load %arg2[%c0, %c0_1, %c0_2] : memref<1x8x32xbf16, #tpu.memory_space<vmem>>, vector<1x8x32xbf16>
    %4 = vector.shape_cast %3 : vector<1x8x32xbf16> to vector<8x32xbf16>
    %c0_3 = arith.constant 0 : index
    %c0_4 = arith.constant 0 : index
    %5 = vector.load %arg5[%c0_3, %c0_4] : memref<32x64xbf16, #tpu.memory_space<vmem>>, vector<32x64xbf16>
    %cst = arith.constant dense<0.000000e+00> : vector<8x64xf32>
    %6 = tpu.matmul %4, %5, %cst {dimension_numbers = #tpu.dot_dimension_numbers<[1], [0], [0], [1], [0, 0, 1, 1], [], []>} : vector<8x32xbf16>, vector<32x64xbf16>, vector<8x64xf32> -> vector<8x64xf32>
    %c0_5 = arith.constant 0 : index
    %c0_6 = arith.constant 0 : index
    %7 = vector.load %arg6[%c0_5, %c0_6] : memref<1x64xf32, #tpu.memory_space<vmem>>, vector<1x64xf32>
    %8 = vector.broadcast %7 : vector<1x64xf32> to vector<8x64xf32>
    %9 = arith.addf %6, %8 : vector<8x64xf32>
    %10 = arith.truncf %9 : vector<8x64xf32> to vector<8x64xbf16>
    %c0_7 = arith.constant 0 : index
    %c0_8 = arith.constant 0 : index
    %c0_9 = arith.constant 0 : index
    %11 = vector.load %arg4[%c0_7, %c0_8, %c0_9] : memref<1x8x8xi8, #tpu.memory_space<vmem>>, vector<1x8x8xi8>
    %12 = vector.shape_cast %11 : vector<1x8x8xi8> to vector<8x8xi8>
    %13 = arith.extsi %12 : vector<8x8xi8> to vector<8x8xi32>
    %c0_i32_10 = arith.constant 0 : i32
    %14 = vector.broadcast %c0_i32_10 : i32 to vector<8x8xi32>
    %15 = arith.cmpi ne, %13, %14 : vector<8x8xi32>
    %c0_11 = arith.constant 0 : index
    %c0_12 = arith.constant 0 : index
    %16 = vector.load %arg10[%c0_11, %c0_12] : memref<8x128xbf16, #tpu.memory_space<vmem>>, vector<8x128xbf16>
    %17 = vector.extract_strided_slice %10 {offsets = [0, 0], sizes = [8, 16], strides = [1, 1]} : vector<8x64xbf16> to vector<8x16xbf16>
    %18 = vector.extract_strided_slice %16 {offsets = [0, 0], sizes = [8, 16], strides = [1, 1]} : vector<8x128xbf16> to vector<8x16xbf16>
    %19 = vector.extract_strided_slice %16 {offsets = [0, 64], sizes = [8, 16], strides = [1, 1]} : vector<8x128xbf16> to vector<8x16xbf16>
    %cst_13 = arith.constant dense<0.000000e+00> : vector<8x8xf32>
    %20 = tpu.matmul %17, %18, %cst_13 {dimension_numbers = #tpu.dot_dimension_numbers<[1], [1], [0], [0], [0, 0, 1, 0], [], []>} : vector<8x16xbf16>, vector<8x16xbf16>, vector<8x8xf32> -> vector<8x8xf32>
    %cst_14 = arith.constant -1.000000e+09 : f32
    %21 = vector.broadcast %cst_14 : f32 to vector<8x8xf32>
    %22 = arith.select %15, %21, %20 : vector<8x8xi1>, vector<8x8xf32>
    %cst_15 = arith.constant dense<0xFF800000> : vector<8xf32>
    %23 = vector.multi_reduction <maximumf>, %22, %cst_15 [1] : vector<8x8xf32> to vector<8xf32>
    %24 = vector.shape_cast %23 : vector<8xf32> to vector<8x1xf32>
    %25 = vector.broadcast %24 : vector<8x1xf32> to vector<8x8xf32>
    %26 = arith.subf %22, %25 : vector<8x8xf32>
    %27 = math.exp %26 : vector<8x8xf32>
    %cst_16 = arith.constant dense<0.000000e+00> : vector<8xf32>
    %28 = vector.multi_reduction <add>, %27, %cst_16 [1] : vector<8x8xf32> to vector<8xf32>
    %29 = vector.shape_cast %28 : vector<8xf32> to vector<8x1xf32>
    %30 = arith.truncf %27 : vector<8x8xf32> to vector<8x8xbf16>
    %cst_17 = arith.constant dense<0.000000e+00> : vector<8x16xf32>
    %31 = tpu.matmul %30, %19, %cst_17 {dimension_numbers = #tpu.dot_dimension_numbers<[1], [0], [0], [1], [0, 0, 1, 1], [], []>} : vector<8x8xbf16>, vector<8x16xbf16>, vector<8x16xf32> -> vector<8x16xf32>
    %32 = tpu.reciprocal %29 {approx = true} : vector<8x1xf32> -> vector<8x1xf32>
    %33 = vector.broadcast %32 : vector<8x1xf32> to vector<8x16xf32>
    %34 = arith.mulf %31, %33 : vector<8x16xf32>
    %c0_18 = arith.constant 0 : index
    %c0_19 = arith.constant 0 : index
    %c0_20 = arith.constant 0 : index
    %35 = vector.load %arg9[%c0_18, %c0_19, %c0_20] : memref<1x8x64xf32, #tpu.memory_space<vmem>>, vector<1x8x16xf32>
    %36 = vector.shape_cast %35 : vector<1x8x16xf32> to vector<8x16xf32>
    %37 = vector.shape_cast %34 : vector<8x16xf32> to vector<1x8x16xf32>
    tpu.vector_store %arg9[%c0_18, %c0_19, %c0_20], %37 {strides = array<i32>} : memref<1x8x64xf32, #tpu.memory_space<vmem>>, vector<1x8x16xf32>,
    %38 = vector.extract_strided_slice %10 {offsets = [0, 16], sizes = [8, 16], strides = [1, 1]} : vector<8x64xbf16> to vector<8x16xbf16>
    %39 = vector.extract_strided_slice %16 {offsets = [0, 16], sizes = [8, 16], strides = [1, 1]} : vector<8x128xbf16> to vector<8x16xbf16>
    %40 = vector.extract_strided_slice %16 {offsets = [0, 80], sizes = [8, 16], strides = [1, 1]} : vector<8x128xbf16> to vector<8x16xbf16>
    %cst_21 = arith.constant dense<0.000000e+00> : vector<8x8xf32>
    %41 = tpu.matmul %38, %39, %cst_21 {dimension_numbers = #tpu.dot_dimension_numbers<[1], [1], [0], [0], [0, 0, 1, 0], [], []>} : vector<8x16xbf16>, vector<8x16xbf16>, vector<8x8xf32> -> vector<8x8xf32>
    %cst_22 = arith.constant -1.000000e+09 : f32
    %42 = vector.broadcast %cst_22 : f32 to vector<8x8xf32>
    %43 = arith.select %15, %42, %41 : vector<8x8xi1>, vector<8x8xf32>
    %cst_23 = arith.constant dense<0xFF800000> : vector<8xf32>
    %44 = vector.multi_reduction <maximumf>, %43, %cst_23 [1] : vector<8x8xf32> to vector<8xf32>
    %45 = vector.shape_cast %44 : vector<8xf32> to vector<8x1xf32>
    %46 = vector.broadcast %45 : vector<8x1xf32> to vector<8x8xf32>
    %47 = arith.subf %43, %46 : vector<8x8xf32>
    %48 = math.exp %47 : vector<8x8xf32>
    %cst_24 = arith.constant dense<0.000000e+00> : vector<8xf32>
    %49 = vector.multi_reduction <add>, %48, %cst_24 [1] : vector<8x8xf32> to vector<8xf32>
    %50 = vector.shape_cast %49 : vector<8xf32> to vector<8x1xf32>
    %51 = arith.truncf %48 : vector<8x8xf32> to vector<8x8xbf16>
    %cst_25 = arith.constant dense<0.000000e+00> : vector<8x16xf32>
    %52 = tpu.matmul %51, %40, %cst_25 {dimension_numbers = #tpu.dot_dimension_numbers<[1], [0], [0], [1], [0, 0, 1, 1], [], []>} : vector<8x8xbf16>, vector<8x16xbf16>, vector<8x16xf32> -> vector<8x16xf32>
    %53 = tpu.reciprocal %50 {approx = true} : vector<8x1xf32> -> vector<8x1xf32>
    %54 = vector.broadcast %53 : vector<8x1xf32> to vector<8x16xf32>
    %55 = arith.mulf %52, %54 : vector<8x16xf32>
    %c0_26 = arith.constant 0 : index
    %c0_27 = arith.constant 0 : index
    %c16 = arith.constant 16 : index
    %56 = vector.load %arg9[%c0_26, %c0_27, %c16] : memref<1x8x64xf32, #tpu.memory_space<vmem>>, vector<1x8x16xf32>
    %57 = vector.shape_cast %56 : vector<1x8x16xf32> to vector<8x16xf32>
    %58 = vector.shape_cast %55 : vector<8x16xf32> to vector<1x8x16xf32>
    tpu.vector_store %arg9[%c0_26, %c0_27, %c16], %58 {strides = array<i32>} : memref<1x8x64xf32, #tpu.memory_space<vmem>>, vector<1x8x16xf32>,
    %59 = vector.extract_strided_slice %10 {offsets = [0, 32], sizes = [8, 16], strides = [1, 1]} : vector<8x64xbf16> to vector<8x16xbf16>
    %60 = vector.extract_strided_slice %16 {offsets = [0, 32], sizes = [8, 16], strides = [1, 1]} : vector<8x128xbf16> to vector<8x16xbf16>
    %61 = vector.extract_strided_slice %16 {offsets = [0, 96], sizes = [8, 16], strides = [1, 1]} : vector<8x128xbf16> to vector<8x16xbf16>
    %cst_28 = arith.constant dense<0.000000e+00> : vector<8x8xf32>
    %62 = tpu.matmul %59, %60, %cst_28 {dimension_numbers = #tpu.dot_dimension_numbers<[1], [1], [0], [0], [0, 0, 1, 0], [], []>} : vector<8x16xbf16>, vector<8x16xbf16>, vector<8x8xf32> -> vector<8x8xf32>
    %cst_29 = arith.constant -1.000000e+09 : f32
    %63 = vector.broadcast %cst_29 : f32 to vector<8x8xf32>
    %64 = arith.select %15, %63, %62 : vector<8x8xi1>, vector<8x8xf32>
    %cst_30 = arith.constant dense<0xFF800000> : vector<8xf32>
    %65 = vector.multi_reduction <maximumf>, %64, %cst_30 [1] : vector<8x8xf32> to vector<8xf32>
    %66 = vector.shape_cast %65 : vector<8xf32> to vector<8x1xf32>
    %67 = vector.broadcast %66 : vector<8x1xf32> to vector<8x8xf32>
    %68 = arith.subf %64, %67 : vector<8x8xf32>
    %69 = math.exp %68 : vector<8x8xf32>
    %cst_31 = arith.constant dense<0.000000e+00> : vector<8xf32>
    %70 = vector.multi_reduction <add>, %69, %cst_31 [1] : vector<8x8xf32> to vector<8xf32>
    %71 = vector.shape_cast %70 : vector<8xf32> to vector<8x1xf32>
    %72 = arith.truncf %69 : vector<8x8xf32> to vector<8x8xbf16>
    %cst_32 = arith.constant dense<0.000000e+00> : vector<8x16xf32>
    %73 = tpu.matmul %72, %61, %cst_32 {dimension_numbers = #tpu.dot_dimension_numbers<[1], [0], [0], [1], [0, 0, 1, 1], [], []>} : vector<8x8xbf16>, vector<8x16xbf16>, vector<8x16xf32> -> vector<8x16xf32>
    %74 = tpu.reciprocal %71 {approx = true} : vector<8x1xf32> -> vector<8x1xf32>
    %75 = vector.broadcast %74 : vector<8x1xf32> to vector<8x16xf32>
    %76 = arith.mulf %73, %75 : vector<8x16xf32>
    %c0_33 = arith.constant 0 : index
    %c0_34 = arith.constant 0 : index
    %c32 = arith.constant 32 : index
    %77 = vector.load %arg9[%c0_33, %c0_34, %c32] : memref<1x8x64xf32, #tpu.memory_space<vmem>>, vector<1x8x16xf32>
    %78 = vector.shape_cast %77 : vector<1x8x16xf32> to vector<8x16xf32>
    %79 = vector.shape_cast %76 : vector<8x16xf32> to vector<1x8x16xf32>
    tpu.vector_store %arg9[%c0_33, %c0_34, %c32], %79 {strides = array<i32>} : memref<1x8x64xf32, #tpu.memory_space<vmem>>, vector<1x8x16xf32>,
    %80 = vector.extract_strided_slice %10 {offsets = [0, 48], sizes = [8, 16], strides = [1, 1]} : vector<8x64xbf16> to vector<8x16xbf16>
    %81 = vector.extract_strided_slice %16 {offsets = [0, 48], sizes = [8, 16], strides = [1, 1]} : vector<8x128xbf16> to vector<8x16xbf16>
    %82 = vector.extract_strided_slice %16 {offsets = [0, 112], sizes = [8, 16], strides = [1, 1]} : vector<8x128xbf16> to vector<8x16xbf16>
    %cst_35 = arith.constant dense<0.000000e+00> : vector<8x8xf32>
    %83 = tpu.matmul %80, %81, %cst_35 {dimension_numbers = #tpu.dot_dimension_numbers<[1], [1], [0], [0], [0, 0, 1, 0], [], []>} : vector<8x16xbf16>, vector<8x16xbf16>, vector<8x8xf32> -> vector<8x8xf32>
    %cst_36 = arith.constant -1.000000e+09 : f32
    %84 = vector.broadcast %cst_36 : f32 to vector<8x8xf32>
    %85 = arith.select %15, %84, %83 : vector<8x8xi1>, vector<8x8xf32>
    %cst_37 = arith.constant dense<0xFF800000> : vector<8xf32>
    %86 = vector.multi_reduction <maximumf>, %85, %cst_37 [1] : vector<8x8xf32> to vector<8xf32>
    %87 = vector.shape_cast %86 : vector<8xf32> to vector<8x1xf32>
    %88 = vector.broadcast %87 : vector<8x1xf32> to vector<8x8xf32>
    %89 = arith.subf %85, %88 : vector<8x8xf32>
    %90 = math.exp %89 : vector<8x8xf32>
    %cst_38 = arith.constant dense<0.000000e+00> : vector<8xf32>
    %91 = vector.multi_reduction <add>, %90, %cst_38 [1] : vector<8x8xf32> to vector<8xf32>
    %92 = vector.shape_cast %91 : vector<8xf32> to vector<8x1xf32>
    %93 = arith.truncf %90 : vector<8x8xf32> to vector<8x8xbf16>
    %cst_39 = arith.constant dense<0.000000e+00> : vector<8x16xf32>
    %94 = tpu.matmul %93, %82, %cst_39 {dimension_numbers = #tpu.dot_dimension_numbers<[1], [0], [0], [1], [0, 0, 1, 1], [], []>} : vector<8x8xbf16>, vector<8x16xbf16>, vector<8x16xf32> -> vector<8x16xf32>
    %95 = tpu.reciprocal %92 {approx = true} : vector<8x1xf32> -> vector<8x1xf32>
    %96 = vector.broadcast %95 : vector<8x1xf32> to vector<8x16xf32>
    %97 = arith.mulf %94, %96 : vector<8x16xf32>
    %c0_40 = arith.constant 0 : index
    %c0_41 = arith.constant 0 : index
    %c48 = arith.constant 48 : index
    %98 = vector.load %arg9[%c0_40, %c0_41, %c48] : memref<1x8x64xf32, #tpu.memory_space<vmem>>, vector<1x8x16xf32>
    %99 = vector.shape_cast %98 : vector<1x8x16xf32> to vector<8x16xf32>
    %100 = vector.shape_cast %97 : vector<8x16xf32> to vector<1x8x16xf32>
    tpu.vector_store %arg9[%c0_40, %c0_41, %c48], %100 {strides = array<i32>} : memref<1x8x64xf32, #tpu.memory_space<vmem>>, vector<1x8x16xf32>,
    return
  }
  func.func @transform_0(%arg0: i32, %arg1: i32) -> (i32, i32, i32) {
    %c0_i32 = arith.constant 0 : i32
    %c0_i32_0 = arith.constant 0 : i32
    return %arg0, %arg1, %c0_i32 : i32, i32, i32
  }
  func.func @transform_1(%arg0: i32, %arg1: i32) -> (i32, i32, i32) {
    %c0_i32 = arith.constant 0 : i32
    %c0_i32_0 = arith.constant 0 : i32
    %c0_i32_1 = arith.constant 0 : i32
    return %arg0, %c0_i32, %c0_i32_0 : i32, i32, i32
  }
  func.func @transform_2(%arg0: i32, %arg1: i32) -> (i32, i32, i32) {
    %c0_i32 = arith.constant 0 : i32
    %c0_i32_0 = arith.constant 0 : i32
    return %arg0, %arg1, %c0_i32 : i32, i32, i32
  }
  func.func @transform_3(%arg0: i32, %arg1: i32) -> (i32, i32) {
    %c0_i32 = arith.constant 0 : i32
    %c0_i32_0 = arith.constant 0 : i32
    %c0_i32_1 = arith.constant 0 : i32
    return %c0_i32, %c0_i32_0 : i32, i32
  }
  func.func @transform_4(%arg0: i32, %arg1: i32) -> (i32, i32) {
    %c0_i32 = arith.constant 0 : i32
    %c0_i32_0 = arith.constant 0 : i32
    %c0_i32_1 = arith.constant 0 : i32
    return %c0_i32, %c0_i32_0 : i32, i32
  }
  func.func @transform_5(%arg0: i32, %arg1: i32) -> (i32, i32) {
    %c0_i32 = arith.constant 0 : i32
    %c0_i32_0 = arith.constant 0 : i32
    %c0_i32_1 = arith.constant 0 : i32
    return %c0_i32, %c0_i32_0 : i32, i32
  }
  func.func @transform_6(%arg0: i32, %arg1: i32) -> (i32, i32) {
    %c0_i32 = arith.constant 0 : i32
    %c0_i32_0 = arith.constant 0 : i32
    %c0_i32_1 = arith.constant 0 : i32
    return %c0_i32, %c0_i32_0 : i32, i32
  }
  func.func @transform_7(%arg0: i32, %arg1: i32) -> (i32, i32, i32) {
    %c0_i32 = arith.constant 0 : i32
    %c0_i32_0 = arith.constant 0 : i32
    return %arg0, %arg1, %c0_i32 : i32, i32, i32
  }
}

module attributes {stable_mosaic.version = 11 : i64} {
  func.func @kernel(%arg0: i32, %arg1: i32, %arg2: memref<1x8x32xbf16, #tpu.memory_space<vmem>>, %arg3: memref<1x8x32xbf16, #tpu.memory_space<vmem>>, %arg4: memref<1x8x8xi8, #tpu.memory_space<vmem>>, %arg5: memref<32x64xbf16, #tpu.memory_space<vmem>>, %arg6: memref<1x64xf32, #tpu.memory_space<vmem>>, %arg7: memref<32x128xbf16, #tpu.memory_space<vmem>>, %arg8: memref<1x128xf32, #tpu.memory_space<vmem>>, %arg9: memref<1x8x64xf32, #tpu.memory_space<vmem>>, %arg10: memref<8x128xbf16, #tpu.memory_space<vmem>>) attributes {dimension_semantics = [#tpu.dimension_semantics<parallel>, #tpu.dimension_semantics<arbitrary>], iteration_bounds = array<i64: 2, 1>, scalar_prefetch = 0 : i64, scratch_operands = 1 : i64, tpu.core_type = #tpu.core_type<tc>, window_params = [{transform_indices = @transform_0, window_bounds = array<i64: 1, 8, 32>}, {transform_indices = @transform_1, window_bounds = array<i64: 1, 8, 32>}, {transform_indices = @transform_2, window_bounds = array<i64: 1, 8, 8>}, {pipeline_mode = #tpu.pipeline_mode<synchronous>, transform_indices = @transform_3, window_bounds = array<i64: 32, 64>}, {pipeline_mode = #tpu.pipeline_mode<synchronous>, transform_indices = @transform_4, window_bounds = array<i64: 1, 64>}, {pipeline_mode = #tpu.pipeline_mode<synchronous>, transform_indices = @transform_5, window_bounds = array<i64: 32, 128>}, {pipeline_mode = #tpu.pipeline_mode<synchronous>, transform_indices = @transform_6, window_bounds = array<i64: 1, 128>}, {transform_indices = @transform_7, window_bounds = array<i64: 1, 8, 64>}]} {
    %c0_i32 = arith.constant 0 : i32
    %0 = arith.cmpi eq, %arg1, %c0_i32 : i32
    %1 = arith.extui %0 : i1 to i32
    %c0_i32_0 = arith.constant 0 : i32
    %2 = arith.cmpi ne, %1, %c0_i32_0 : i32
    scf.if %2 {
      %c0_42 = arith.constant 0 : index
      %c0_43 = arith.constant 0 : index
      %c0_44 = arith.constant 0 : index
      %101 = vector.load %arg3[%c0_42, %c0_43, %c0_44] : memref<1x8x32xbf16, #tpu.memory_space<vmem>>, vector<1x8x32xbf16>
      %102 = vector.shape_cast %101 : vector<1x8x32xbf16> to vector<8x32xbf16>
      %c0_45 = arith.constant 0 : index
      %c0_46 = arith.constant 0 : index
      %103 = vector.load %arg7[%c0_45, %c0_46] : memref<32x128xbf16, #tpu.memory_space<vmem>>, vector<32x128xbf16>
      %cst_47 = arith.constant dense<0.000000e+00> : vector<8x128xf32>
      %104 = tpu.matmul %102, %103, %cst_47 {dimension_numbers = #tpu.dot_dimension_numbers<[1], [0], [0], [1], [0, 0, 1, 1], [], []>} : vector<8x32xbf16>, vector<32x128xbf16>, vector<8x128xf32> -> vector<8x128xf32>
      %c0_48 = arith.constant 0 : index
      %c0_49 = arith.constant 0 : index
      %105 = vector.load %arg8[%c0_48, %c0_49] : memref<1x128xf32, #tpu.memory_space<vmem>>, vector<1x128xf32>
      %106 = vector.broadcast %105 : vector<1x128xf32> to vector<8x128xf32>
      %107 = arith.addf %104, %106 : vector<8x128xf32>
      %108 = arith.truncf %107 : vector<8x128xf32> to vector<8x128xbf16>
      %c0_50 = arith.constant 0 : index
      %c0_51 = arith.constant 0 : index
      %109 = vector.load %arg10[%c0_50, %c0_51] : memref<8x128xbf16, #tpu.memory_space<vmem>>, vector<8x128xbf16>
      tpu.vector_store %arg10[%c0_50, %c0_51], %108 {strides = array<i32>} : memref<8x128xbf16, #tpu.memory_space<vmem>>, vector<8x128xbf16>,
    } else {
    }
    %c0 = arith.constant 0 : index
    %c0_1 = arith.constant 0 : index
    %c0_2 = arith.constant 0 : index
    %3 = vector.load %arg2[%c0, %c0_1, %c0_2] : memref<1x8x32xbf16, #tpu.memory_space<vmem>>, vector<1x8x32xbf16>
    %4 = vector.shape_cast %3 : vector<1x8x32xbf16> to vector<8x32xbf16>
    %c0_3 = arith.constant 0 : index
    %c0_4 = arith.constant 0 : index
    %5 = vector.load %arg5[%c0_3, %c0_4] : memref<32x64xbf16, #tpu.memory_space<vmem>>, vector<32x64xbf16>
    %cst = arith.constant dense<0.000000e+00> : vector<8x64xf32>
    %6 = tpu.matmul %4, %5, %cst {dimension_numbers = #tpu.dot_dimension_numbers<[1], [0], [0], [1], [0, 0, 1, 1], [], []>} : vector<8x32xbf16>, vector<32x64xbf16>, vector<8x64xf32> -> vector<8x64xf32>
    %c0_5 = arith.constant 0 : index
    %c0_6 = arith.constant 0 : index
    %7 = vector.load %arg6[%c0_5, %c0_6] : memref<1x64xf32, #tpu.memory_space<vmem>>, vector<1x64xf32>
    %8 = vector.broadcast %7 : vector<1x64xf32> to vector<8x64xf32>
    %9 = arith.addf %6, %8 : vector<8x64xf32>
    %10 = arith.truncf %9 : vector<8x64xf32> to vector<8x64xbf16>
    %c0_7 = arith.constant 0 : index
    %c0_8 = arith.constant 0 : index
    %c0_9 = arith.constant 0 : index
    %11 = vector.load %arg4[%c0_7, %c0_8, %c0_9] : memref<1x8x8xi8, #tpu.memory_space<vmem>>, vector<1x8x8xi8>
    %12 = vector.shape_cast %11 : vector<1x8x8xi8> to vector<8x8xi8>
    %13 = arith.extsi %12 : vector<8x8xi8> to vector<8x8xi32>
    %c0_i32_10 = arith.constant 0 : i32
    %14 = vector.broadcast %c0_i32_10 : i32 to vector<8x8xi32>
    %15 = arith.cmpi ne, %13, %14 : vector<8x8xi32>
    %c0_11 = arith.constant 0 : index
    %c0_12 = arith.constant 0 : index
    %16 = vector.load %arg10[%c0_11, %c0_12] : memref<8x128xbf16, #tpu.memory_space<vmem>>, vector<8x128xbf16>
    %17 = vector.extract_strided_slice %10 {offsets = [0, 0], sizes = [8, 16], strides = [1, 1]} : vector<8x64xbf16> to vector<8x16xbf16>
    %18 = vector.extract_strided_slice %16 {offsets = [0, 0], sizes = [8, 16], strides = [1, 1]} : vector<8x128xbf16> to vector<8x16xbf16>
    %19 = vector.extract_strided_slice %16 {offsets = [0, 64], sizes = [8, 16], strides = [1, 1]} : vector<8x128xbf16> to vector<8x16xbf16>
    %cst_13 = arith.constant dense<0.000000e+00> : vector<8x8xf32>
    %20 = tpu.matmul %17, %18, %cst_13 {dimension_numbers = #tpu.dot_dimension_numbers<[1], [1], [0], [0], [0, 0, 1, 0], [], []>} : vector<8x16xbf16>, vector<8x16xbf16>, vector<8x8xf32> -> vector<8x8xf32>
    %cst_14 = arith.constant -1.000000e+09 : f32
    %21 = vector.broadcast %cst_14 : f32 to vector<8x8xf32>
    %22 = arith.select %15, %21, %20 : vector<8x8xi1>, vector<8x8xf32>
    %cst_15 = arith.constant dense<0xFF800000> : vector<8xf32>
    %23 = vector.multi_reduction <maximumf>, %22, %cst_15 [1] : vector<8x8xf32> to vector<8xf32>
    %24 = vector.shape_cast %23 : vector<8xf32> to vector<8x1xf32>
    %25 = vector.broadcast %24 : vector<8x1xf32> to vector<8x8xf32>
    %26 = arith.subf %22, %25 : vector<8x8xf32>
    %27 = math.exp %26 : vector<8x8xf32>
    %cst_16 = arith.constant dense<0.000000e+00> : vector<8xf32>
    %28 = vector.multi_reduction <add>, %27, %cst_16 [1] : vector<8x8xf32> to vector<8xf32>
    %29 = vector.shape_cast %28 : vector<8xf32> to vector<8x1xf32>
    %30 = arith.truncf %27 : vector<8x8xf32> to vector<8x8xbf16>
    %cst_17 = arith.constant dense<0.000000e+00> : vector<8x16xf32>
    %31 = tpu.matmul %30, %19, %cst_17 {dimension_numbers = #tpu.dot_dimension_numbers<[1], [0], [0], [1], [0, 0, 1, 1], [], []>} : vector<8x8xbf16>, vector<8x16xbf16>, vector<8x16xf32> -> vector<8x16xf32>
    %32 = tpu.reciprocal %29 {approx = true} : vector<8x1xf32> -> vector<8x1xf32>
    %33 = vector.broadcast %32 : vector<8x1xf32> to vector<8x16xf32>
    %34 = arith.mulf %31, %33 : vector<8x16xf32>
    %c0_18 = arith.constant 0 : index
    %c0_19 = arith.constant 0 : index
    %c0_20 = arith.constant 0 : index
    %35 = vector.load %arg9[%c0_18, %c0_19, %c0_20] : memref<1x8x64xf32, #tpu.memory_space<vmem>>, vector<1x8x16xf32>
    %36 = vector.shape_cast %35 : vector<1x8x16xf32> to vector<8x16xf32>
    %37 = vector.shape_cast %34 : vector<8x16xf32> to vector<1x8x16xf32>
    tpu.vector_store %arg9[%c0_18, %c0_19, %c0_20], %37 {strides = array<i32>} : memref<1x8x64xf32, #tpu.memory_space<vmem>>, vector<1x8x16xf32>,
    %38 = vector.extract_strided_slice %10 {offsets = [0, 16], sizes = [8, 16], strides = [1, 1]} : vector<8x64xbf16> to vector<8x16xbf16>
    %39 = vector.extract_strided_slice %16 {offsets = [0, 16], sizes = [8, 16], strides = [1, 1]} : vector<8x128xbf16> to vector<8x16xbf16>
    %40 = vector.extract_strided_slice %16 {offsets = [0, 80], sizes = [8, 16], strides = [1, 1]} : vector<8x128xbf16> to vector<8x16xbf16>
    %cst_21 = arith.constant dense<0.000000e+00> : vector<8x8xf32>
    %41 = tpu.matmul %38, %39, %cst_21 {dimension_numbers = #tpu.dot_dimension_numbers<[1], [1], [0], [0], [0, 0, 1, 0], [], []>} : vector<8x16xbf16>, vector<8x16xbf16>, vector<8x8xf32> -> vector<8x8xf32>
    %cst_22 = arith.constant -1.000000e+09 : f32
    %42 = vector.broadcast %cst_22 : f32 to vector<8x8xf32>
    %43 = arith.select %15, %42, %41 : vector<8x8xi1>, vector<8x8xf32>
    %cst_23 = arith.constant dense<0xFF800000> : vector<8xf32>
    %44 = vector.multi_reduction <maximumf>, %43, %cst_23 [1] : vector<8x8xf32> to vector<8xf32>
    %45 = vector.shape_cast %44 : vector<8xf32> to vector<8x1xf32>
    %46 = vector.broadcast %45 : vector<8x1xf32> to vector<8x8xf32>
    %47 = arith.subf %43, %46 : vector<8x8xf32>
    %48 = math.exp %47 : vector<8x8xf32>
    %cst_24 = arith.constant dense<0.000000e+00> : vector<8xf32>
    %49 = vector.multi_reduction <add>, %48, %cst_24 [1] : vector<8x8xf32> to vector<8xf32>
    %50 = vector.shape_cast %49 : vector<8xf32> to vector<8x1xf32>
    %51 = arith.truncf %48 : vector<8x8xf32> to vector<8x8xbf16>
    %cst_25 = arith.constant dense<0.000000e+00> : vector<8x16xf32>
    %52 = tpu.matmul %51, %40, %cst_25 {dimension_numbers = #tpu.dot_dimension_numbers<[1], [0], [0], [1], [0, 0, 1, 1], [], []>} : vector<8x8xbf16>, vector<8x16xbf16>, vector<8x16xf32> -> vector<8x16xf32>
    %53 = tpu.reciprocal %50 {approx = true} : vector<8x1xf32> -> vector<8x1xf32>
    %54 = vector.broadcast %53 : vector<8x1xf32> to vector<8x16xf32>
    %55 = arith.mulf %52, %54 : vector<8x16xf32>
    %c0_26 = arith.constant 0 : index
    %c0_27 = arith.constant 0 : index
    %c16 = arith.constant 16 : index
    %56 = vector.load %arg9[%c0_26, %c0_27, %c16] : memref<1x8x64xf32, #tpu.memory_space<vmem>>, vector<1x8x16xf32>
    %57 = vector.shape_cast %56 : vector<1x8x16xf32> to vector<8x16xf32>
    %58 = vector.shape_cast %55 : vector<8x16xf32> to vector<1x8x16xf32>
    tpu.vector_store %arg9[%c0_26, %c0_27, %c16], %58 {strides = array<i32>} : memref<1x8x64xf32, #tpu.memory_space<vmem>>, vector<1x8x16xf32>,
    %59 = vector.extract_strided_slice %10 {offsets = [0, 32], sizes = [8, 16], strides = [1, 1]} : vector<8x64xbf16> to vector<8x16xbf16>
    %60 = vector.extract_strided_slice %16 {offsets = [0, 32], sizes = [8, 16], strides = [1, 1]} : vector<8x128xbf16> to vector<8x16xbf16>
    %61 = vector.extract_strided_slice %16 {offsets = [0, 96], sizes = [8, 16], strides = [1, 1]} : vector<8x128xbf16> to vector<8x16xbf16>
    %cst_28 = arith.constant dense<0.000000e+00> : vector<8x8xf32>
    %62 = tpu.matmul %59, %60, %cst_28 {dimension_numbers = #tpu.dot_dimension_numbers<[1], [1], [0], [0], [0, 0, 1, 0], [], []>} : vector<8x16xbf16>, vector<8x16xbf16>, vector<8x8xf32> -> vector<8x8xf32>
    %cst_29 = arith.constant -1.000000e+09 : f32
    %63 = vector.broadcast %cst_29 : f32 to vector<8x8xf32>
    %64 = arith.select %15, %63, %62 : vector<8x8xi1>, vector<8x8xf32>
    %cst_30 = arith.constant dense<0xFF800000> : vector<8xf32>
    %65 = vector.multi_reduction <maximumf>, %64, %cst_30 [1] : vector<8x8xf32> to vector<8xf32>
    %66 = vector.shape_cast %65 : vector<8xf32> to vector<8x1xf32>
    %67 = vector.broadcast %66 : vector<8x1xf32> to vector<8x8xf32>
    %68 = arith.subf %64, %67 : vector<8x8xf32>
    %69 = math.exp %68 : vector<8x8xf32>
    %cst_31 = arith.constant dense<0.000000e+00> : vector<8xf32>
    %70 = vector.multi_reduction <add>, %69, %cst_31 [1] : vector<8x8xf32> to vector<8xf32>
    %71 = vector.shape_cast %70 : vector<8xf32> to vector<8x1xf32>
    %72 = arith.truncf %69 : vector<8x8xf32> to vector<8x8xbf16>
    %cst_32 = arith.constant dense<0.000000e+00> : vector<8x16xf32>
    %73 = tpu.matmul %72, %61, %cst_32 {dimension_numbers = #tpu.dot_dimension_numbers<[1], [0], [0], [1], [0, 0, 1, 1], [], []>} : vector<8x8xbf16>, vector<8x16xbf16>, vector<8x16xf32> -> vector<8x16xf32>
    %74 = tpu.reciprocal %71 {approx = true} : vector<8x1xf32> -> vector<8x1xf32>
    %75 = vector.broadcast %74 : vector<8x1xf32> to vector<8x16xf32>
    %76 = arith.mulf %73, %75 : vector<8x16xf32>
    %c0_33 = arith.constant 0 : index
    %c0_34 = arith.constant 0 : index
    %c32 = arith.constant 32 : index
    %77 = vector.load %arg9[%c0_33, %c0_34, %c32] : memref<1x8x64xf32, #tpu.memory_space<vmem>>, vector<1x8x16xf32>
    %78 = vector.shape_cast %77 : vector<1x8x16xf32> to vector<8x16xf32>
    %79 = vector.shape_cast %76 : vector<8x16xf32> to vector<1x8x16xf32>
    tpu.vector_store %arg9[%c0_33, %c0_34, %c32], %79 {strides = array<i32>} : memref<1x8x64xf32, #tpu.memory_space<vmem>>, vector<1x8x16xf32>,
    %80 = vector.extract_strided_slice %10 {offsets = [0, 48], sizes = [8, 16], strides = [1, 1]} : vector<8x64xbf16> to vector<8x16xbf16>
    %81 = vector.extract_strided_slice %16 {offsets = [0, 48], sizes = [8, 16], strides = [1, 1]} : vector<8x128xbf16> to vector<8x16xbf16>
    %82 = vector.extract_strided_slice %16 {offsets = [0, 112], sizes = [8, 16], strides = [1, 1]} : vector<8x128xbf16> to vector<8x16xbf16>
    %cst_35 = arith.constant dense<0.000000e+00> : vector<8x8xf32>
    %83 = tpu.matmul %80, %81, %cst_35 {dimension_numbers = #tpu.dot_dimension_numbers<[1], [1], [0], [0], [0, 0, 1, 0], [], []>} : vector<8x16xbf16>, vector<8x16xbf16>, vector<8x8xf32> -> vector<8x8xf32>
    %cst_36 = arith.constant -1.000000e+09 : f32
    %84 = vector.broadcast %cst_36 : f32 to vector<8x8xf32>
    %85 = arith.select %15, %84, %83 : vector<8x8xi1>, vector<8x8xf32>
    %cst_37 = arith.constant dense<0xFF800000> : vector<8xf32>
    %86 = vector.multi_reduction <maximumf>, %85, %cst_37 [1] : vector<8x8xf32> to vector<8xf32>
    %87 = vector.shape_cast %86 : vector<8xf32> to vector<8x1xf32>
    %88 = vector.broadcast %87 : vector<8x1xf32> to vector<8x8xf32>
    %89 = arith.subf %85, %88 : vector<8x8xf32>
    %90 = math.exp %89 : vector<8x8xf32>
    %cst_38 = arith.constant dense<0.000000e+00> : vector<8xf32>
    %91 = vector.multi_reduction <add>, %90, %cst_38 [1] : vector<8x8xf32> to vector<8xf32>
    %92 = vector.shape_cast %91 : vector<8xf32> to vector<8x1xf32>
    %93 = arith.truncf %90 : vector<8x8xf32> to vector<8x8xbf16>
    %cst_39 = arith.constant dense<0.000000e+00> : vector<8x16xf32>
    %94 = tpu.matmul %93, %82, %cst_39 {dimension_numbers = #tpu.dot_dimension_numbers<[1], [0], [0], [1], [0, 0, 1, 1], [], []>} : vector<8x8xbf16>, vector<8x16xbf16>, vector<8x16xf32> -> vector<8x16xf32>
    %95 = tpu.reciprocal %92 {approx = true} : vector<8x1xf32> -> vector<8x1xf32>
    %96 = vector.broadcast %95 : vector<8x1xf32> to vector<8x16xf32>
    %97 = arith.mulf %94, %96 : vector<8x16xf32>
    %c0_40 = arith.constant 0 : index
    %c0_41 = arith.constant 0 : index
    %c48 = arith.constant 48 : index
    %98 = vector.load %arg9[%c0_40, %c0_41, %c48] : memref<1x8x64xf32, #tpu.memory_space<vmem>>, vector<1x8x16xf32>
    %99 = vector.shape_cast %98 : vector<1x8x16xf32> to vector<8x16xf32>
    %100 = vector.shape_cast %97 : vector<8x16xf32> to vector<1x8x16xf32>
    tpu.vector_store %arg9[%c0_40, %c0_41, %c48], %100 {strides = array<i32>} : memref<1x8x64xf32, #tpu.memory_space<vmem>>, vector<1x8x16xf32>,
    return
  }
  func.func @transform_0(%arg0: i32, %arg1: i32) -> (i32, i32, i32) {
    %c0_i32 = arith.constant 0 : i32
    %c0_i32_0 = arith.constant 0 : i32
    return %arg0, %arg1, %c0_i32 : i32, i32, i32
  }
  func.func @transform_1(%arg0: i32, %arg1: i32) -> (i32, i32, i32) {
    %c0_i32 = arith.constant 0 : i32
    %c0_i32_0 = arith.constant 0 : i32
    %c0_i32_1 = arith.constant 0 : i32
    return %arg0, %c0_i32, %c0_i32_0 : i32, i32, i32
  }
  func.func @transform_2(%arg0: i32, %arg1: i32) -> (i32, i32, i32) {
    %c0_i32 = arith.constant 0 : i32
    %c0_i32_0 = arith.constant 0 : i32
    return %arg0, %arg1, %c0_i32 : i32, i32, i32
  }
  func.func @transform_3(%arg0: i32, %arg1: i32) -> (i32, i32) {
    %c0_i32 = arith.constant 0 : i32
    %c0_i32_0 = arith.constant 0 : i32
    %c0_i32_1 = arith.constant 0 : i32
    return %c0_i32, %c0_i32_0 : i32, i32
  }
  func.func @transform_4(%arg0: i32, %arg1: i32) -> (i32, i32) {
    %c0_i32 = arith.constant 0 : i32
    %c0_i32_0 = arith.constant 0 : i32
    %c0_i32_1 = arith.constant 0 : i32
    return %c0_i32, %c0_i32_0 : i32, i32
  }
  func.func @transform_5(%arg0: i32, %arg1: i32) -> (i32, i32) {
    %c0_i32 = arith.constant 0 : i32
    %c0_i32_0 = arith.constant 0 : i32
    %c0_i32_1 = arith.constant 0 : i32
    return %c0_i32, %c0_i32_0 : i32, i32
  }
  func.func @transform_6(%arg0: i32, %arg1: i32) -> (i32, i32) {
    %c0_i32 = arith.constant 0 : i32
    %c0_i32_0 = arith.constant 0 : i32
    %c0_i32_1 = arith.constant 0 : i32
    return %c0_i32, %c0_i32_0 : i32, i32
  }
  func.func @transform_7(%arg0: i32, %arg1: i32) -> (i32, i32, i32) {
    %c0_i32 = arith.constant 0 : i32
    %c0_i32_0 = arith.constant 0 : i32
    return %arg0, %arg1, %c0_i32 : i32, i32, i32
  }
}

</mosaic_0001>

<bundles_post_ra>
// kernel: tpu_custom_call.1
= control target key start
LH: loop header
LB: loop body
LE: loop exit
PB: predicated region body
PF: predicated region fallthrough
CT: control target
= control target key end

     0   :  { %s2048_s0 = inlined_call_operand.hbm [shape: bf16[2,8,32], index: 0, kind: input, shape index: {}]   ;;  %s2049_s1 = inlined_call_operand.hbm [shape: bf16[2,8,32], index: 1, kind: input, shape index: {}]   ;;  %s2050_s2 = inlined_call_operand.hbm [shape: s8[2,8,8], index: 2, kind: input, shape index: {}]   ;;  %s2051_s3 = inlined_call_operand.hbm [shape: bf16[32,64], index: 3, kind: input, shape index: {}]   ;;  %s2052_s4 = inlined_call_operand.vmem [shape: f32[1,64], index: 4, kind: input, shape index: {}]   ;;  %s2053_s5 = inlined_call_operand.hbm [shape: bf16[32,128], index: 5, kind: input, shape index: {}]   ;;  %s2054_s6 = inlined_call_operand.vmem [shape: f32[1,128], index: 6, kind: input, shape index: {}]   ;;  %s2055_s7 = inlined_call_operand.hbm [shape: f32[2,8,64], index: 7, kind: output, shape index: {}]  }
   0x1   :  { %2070 = sst [smem:[#allocation23_spill]] %s2049_s1 }
   0x2   :  { %2071 = sst [smem:[#allocation24_spill]] %s2051_s3 }
   0x3   :  { %12 = vsyncpa [#allocation4], 0 }
   0x4   :  { %14 = vsyncpa [#allocation4 + $0x1], 0 }
   0x5   :  { %15 = vsyncpa [#allocation7], 0 }
   0x6   :  { %17 = vsyncpa [#allocation7 + $0x1], 0 }
   0x7   :  { %18 = vsyncpa [#allocation10], 0 }
   0x8   :  { %19 = vsyncpa [#allocation5], 0 }
   0x9   :  { %21 = vsyncpa [#allocation5 + $0x1], 0  ;;  %s1720_s24 = smov 0   ;;  %s1722_s25 = smov 0  }
   0xa   :  { %s1724_s26 = smov 0   ;;  %s1726_s27 = smov 0  }
   0xb   :  { %s1728_s28 = smov 0   ;;  %s1730_s29 = smov 0  }
   0xc LB: > { %2072 = sst [smem:[#allocation17_spill]] %s1641_s24  ;;  %s1751_s30 = sadd.s32 4294967295, %s1661_s29   ;;  %s1661_s29 = sphi %s1730_s29, %s27_s29   ;;  %s1657_s28 = sphi %s1728_s28, %s2110_s28   ;;  %s1653_s27 = sphi %s1726_s27, %s2109_s27   ;;  %s1649_s26 = sphi %s1724_s26, %s2105_s26   ;;  %s1645_s25 = sphi %s1722_s25, %s2108_s25   ;;  %s1641_s24 = sphi %s1720_s24, %s2107_s24  }
   0xd   : > { %2073 = sst [smem:[#allocation18_spill]] %s1649_s26  ;;  %s1187_s8 = sadd.s32 4294967294, %s1661_s29  }
   0xe   : > { %2074 = sst [smem:[#allocation19_spill]] %s1661_s29  ;;  %p61_p0 = scmp.ne.s32.totalorder %s1645_s25, %s1641_s24 }
   0xf   : > { %p2064_p1 = scmp.eq.s32.totalorder %s1751_s30, 0  ;;  %p231_p3 = scmp.eq.s32.totalorder %s1187_s8, 1 }
  0x10   : > { %p1188_p5 = scmp.ge.s32.totalorder %s1661_s29, 1  ;;  %p238_p7 = scmp.lt.s32.totalorder %s1661_s29, 3 }
  0x11   : > { %p1760_p4 = por %p2064_p1, %p61_p0  ;;  %p1765_p6 = por %p231_p3, %p61_p0 }
  0x12   : > { %p1770_p8 = pnand %p1188_p5, %p238_p7  ;;  %s1663_s12 = smov [#allocation9]  }
  0x13   : > { %s2075_s9 = scalar_select %p1760_p4, 1, 0 }
  0x14   : > { %s2076_s10 = scalar_select %p1765_p6, 1, 0 }
  0x15   : > { %s2078_s11 = scalar_select %p1770_p8, 1, 0 }
  0x16   : > { %2077 = sst [smem:[#allocation20_spill]] %s2076_s10  ;;  %s250_s13 = sshll.u32 %s1663_s12, 4  ;;  %s251_s13 = int_to_ptr.vmem [resolvable:$true] %s250_s13 }
  0x17   : > { %p1328_p9 = pneg %p1770_p8  ;;  %s39_s15 = sadd.s32 1, %s1657_s28 }
  0x18   : > { %s1448_s16 = scalar_lea.vmem %s251_s13, 256  ;;  %p1456_p5 = scmp.lt.s32.totalorder %s251_s13, %s251_s13 }
  0x19   : > { %p1779_p11 = pnand %p1328_p9, %p2064_p1  ;;  %p1449_p13 = scmp.ne.s32.totalorder %s251_s13, %s1448_s16 }
  0x1a   : > { %p1457_p7 = scmp.lt.s32.totalorder %s1448_s16, %s1448_s16 }
  0x1b   : > { %p2065_p12 = pneg %p1779_p11 }
  0x1c   : > { %p1458_p2 = por %p1457_p7, %p1456_p5 }
  0x1d   : > { %p1451_p0 = pnand %p1449_p13, %p2065_p12 }
  0x1f   : > { %p1452_p3 = pneg %p1451_p0 }
  0x21   : > { %p1459_p10 = pnand %p1458_p2, %p1452_p3 }
  0x23   : > { %1462 = shalt.err (!%p1459_p10)
}
  0x24   : > { %s2056_s17 = smov 64   ;;  %s2057_s18 = smov 4  }
  0x25   : > { %s2080_s3 = sld [smem:[#allocation24_spill]]  ;;  %p41_p2 = scmp.ge.s32.totalorder %s39_s15, 2 }
  0x26   : > { %s48_s21 = sadd.s32 1, %s1649_s26  ;;  %p55_p9 = scmp.ne.s32.totalorder %s1649_s26, %s1645_s25 }
  0x27   : > { %p56_p10 = scmp.eq.s32.totalorder %s1661_s29, 0  ;;  %s2112_s15 = smov (%p41_p2, %s39_s15), 0 }
  0x28   : > { %2081 = sst [smem:[#allocation21_spill]] %s2112_s15  ;;  %p2082_p0 = scmp.eq.s32.totalorder %s1751_s30, 1 }
  0x29   : > { %p57_p13 = por %p56_p10, %p55_p9  ;;  %s43_s23 = ssub.s32 %s1657_s28, %s2112_s15 }
  0x2a   : > { %p1805_p3 = por %p2082_p0, %p55_p9  ;;  %p1351_p5 = scmp.lt.s32.totalorder %s1661_s29, 2 }
  0x2b   : > { %1331 = dma.hbm_to_vmem [thread:$0]  (!%p1779_p11), %s2080_s3, 256, %s251_s13, [#allocation10], %s2056_s17, %s2056_s17, %s2057_s18  }
  0x2c   : > { %s2083_s22 = scalar_select %p1805_p3, 1, 0 }
  0x2d   : > { %p46_p7 = scmp.eq.s32.totalorder %s43_s23, 0  ;;  %s1813_s8 = sand.u32 1, %s1649_s26  }
  0x2e   : > { %s1192_s12 = sshll.u32 %s1813_s8, 2  ;;  %s1193_s13 = sshll.u32 %s1657_s28, 6 }
  0x2f   : > { %s1818_s16 = scalar_select %p46_p7, %s1649_s26, %s48_s21  }
  0x30   : > { %p1820_p2 = pnand %p1351_p5, %p57_p13  ;;  %s302_s20 = sand.u32 1, %s1661_s29  }
  0x31   : > { %2084 = sst [smem:[#allocation22_spill]] %s1818_s16  ;;  %s306_s3 = scalar_lea.vmem [#allocation6], %s1192_s12 }
  0x32   : > { %s2086_s1 = sld [smem:[#allocation23_spill]]  ;;  %s313_s15 = sshll.u32 %s306_s3, 4  ;;  %s314_s15 = int_to_ptr.vmem [resolvable:$true] %s313_s15 }
  0x33   : > { %s1666_s10 = smov [#allocation11]   ;;  %s1832_s21 = scalar_lea.sflag [#allocation7], %s302_s20 }
  0x34   : > { %s266_s24 = sshll.u32 %s1666_s10, 4  ;;  %p2066_p9 = pneg %p1820_p2  ;;  %s267_s24 = int_to_ptr.vmem [resolvable:$true] %s266_s24 }
  0x35   : > { %s1476_s16 = scalar_lea.vmem %s314_s15, 64  ;;  %s1667_s26 = smov [#allocation6]  }
  0x36   : > { %p1477_p10 = scmp.ne.s32.totalorder %s314_s15, %s1476_s16  ;;  %s1481_s29 = sshll.u32 %s1667_s26, 4  ;;  %s1482_s29 = int_to_ptr.vmem [resolvable:$false] %s1481_s29 }
  0x37   : > { %s1483_s17 = scalar_lea.vmem %s1482_s29, 128  ;;  %p1484_p5 = scmp.lt.s32.totalorder %s314_s15, %s1482_s29 }
  0x38   : > { %s311_s23 = scalar_lea.hbm %s2086_s1, %s1193_s13  ;;  %p1479_p13 = pnand %p1477_p10, %p2066_p9 }
  0x39   : > { %p1485_p7 = scmp.lt.s32.totalorder %s1483_s17, %s1476_s16 }
  0x3a   : > { %p1480_p0 = pneg %p1479_p13 }
  0x3b   : > { %p1486_p1 = por %p1485_p7, %p1484_p5 }
  0x3d   : > { %p1487_p12 = pnand %p1486_p1, %p1480_p0 }
  0x3f   : > { %1490 = shalt.err (!%p1487_p12)
}
  0x40   : > { %1341 = dma.hbm_to_vmem [thread:$0]  (!%p1820_p2), %s311_s23, 64, %s314_s15, %s1832_s21  }
  0x41   : > { %s1502_s3 = scalar_lea.vmem %s267_s24, 256  ;;  %p2087_p10 = pneg %p1779_p11 }
  0x42   : > { %p1503_p6 = scmp.ne.s32.totalorder %s267_s24, %s1502_s3  ;;  %p1510_p3 = scmp.lt.s32.totalorder %s267_s24, %s267_s24 }
  0x43   : > { %p1511_p4 = scmp.lt.s32.totalorder %s1502_s3, %s1502_s3 }
  0x44   : > { %p1505_p13 = pnand %p1503_p6, %p2087_p10 }
  0x45   : > { %p1512_p8 = por %p1511_p4, %p1510_p3 }
  0x46   : > { %p1506_p9 = pneg %p1505_p13 }
  0x48   : > { %p1513_p5 = pnand %p1512_p8, %p1506_p9 }
  0x4a   : > { %1516 = shalt.err (!%p1513_p5)
}
  0x4b   : > { %s2088_s26 = smov 4   ;;  %s2089_s29 = smov 64  }
  0x4c   : > { %1334 = dma.hbm_to_vmem [thread:$0]  (!%p1779_p11), %s2053_s5, 256, %s267_s24, [#allocation10], %s2089_s29, %s2089_s29, %s2088_s26  }
  0x4d   : > { %s293_s20 = scalar_lea.hbm %s2048_s0, %s1193_s13  ;;  %s287_s23 = scalar_lea.vmem [#allocation3], %s1192_s12 }
  0x4e   : > { %s295_s14 = sshll.u32 %s287_s23, 4  ;;  %s1196_s17 = sshll.u32 %s1813_s8, 1  ;;  %s296_s14 = int_to_ptr.vmem [resolvable:$true] %s295_s14 }
  0x4f   : > { %s284_s3 = scalar_lea.sflag [#allocation4], %s1813_s8  ;;  %s1530_s1 = scalar_lea.vmem %s296_s14, 64 }
  0x50   : > { %p1531_p1 = scmp.ne.s32.totalorder %s296_s14, %s1530_s1  ;;  %p2090_p4 = pneg %p1820_p2 }
  0x51   : > { %s1668_s10 = smov [#allocation3]  }
  0x52   : > { %p1533_p6 = pnand %p1531_p1, %p2090_p4  ;;  %s1535_s18 = sshll.u32 %s1668_s10, 4  ;;  %s1536_s18 = int_to_ptr.vmem [resolvable:$false] %s1535_s18 }
  0x53   : > { %s1537_s24 = scalar_lea.vmem %s1536_s18, 128  ;;  %p1538_p11 = scmp.lt.s32.totalorder %s296_s14, %s1536_s18 }
  0x54   : > { %p1534_p8 = pneg %p1533_p6  ;;  %p1539_p12 = scmp.lt.s32.totalorder %s1537_s24, %s1530_s1 }
  0x56   : > { %p1540_p3 = por %p1539_p12, %p1538_p11 }
  0x58   : > { %p1541_p9 = pnand %p1540_p3, %p1534_p8 }
  0x5a   : > { %1544 = shalt.err (!%p1541_p9)
}
  0x5b   : > { %1338 = dma.hbm_to_vmem [thread:$0]  (!%p1820_p2), %s293_s20, 64, %s296_s14, %s284_s3  }
  0x5c   : > { %s1197_s8 = sshll.u32 %s1657_s28, 5  ;;  %s324_s12 = scalar_lea.vmem [#allocation8], %s1196_s17 }
  0x5d   : > { %s332_s13 = sshll.u32 %s324_s12, 4  ;;  %s330_s15 = scalar_lea.hbm %s2050_s2, %s1197_s8  ;;  %s333_s13 = int_to_ptr.vmem [resolvable:$true] %s332_s13 }
  0x5e   : > { %s1558_s16 = scalar_lea.vmem %s333_s13, 32  ;;  %p2091_p7 = pmov %p2090_p4 }
  0x5f   : > { %p1559_p0 = scmp.ne.s32.totalorder %s333_s13, %s1558_s16  ;;  %s1669_s1 = smov [#allocation8]  }
  0x60   : > { %s1563_s23 = sshll.u32 %s1669_s1, 4  ;;  %s1564_s23 = int_to_ptr.vmem [resolvable:$false] %s1563_s23 }
  0x61   : > { %p1561_p10 = pnand %p1559_p0, %p2091_p7  ;;  %s1565_s10 = scalar_lea.vmem %s1564_s23, 64 }
  0x62   : > { %p1566_p5 = scmp.lt.s32.totalorder %s333_s13, %s1564_s23  ;;  %p1567_p1 = scmp.lt.s32.totalorder %s1565_s10, %s1558_s16 }
  0x63   : > { %p1562_p13 = pneg %p1561_p10 }
  0x64   : > { %p1568_p4 = por %p1567_p1, %p1566_p5 }
  0x66   : > { %p1569_p6 = pnand %p1568_p4, %p1562_p13 }
  0x68   : > { %1572 = shalt.err (!%p1569_p6)
}
  0x69   : > { %1344 = dma.hbm_to_vmem [thread:$0]  (!%p1820_p2), %s330_s15, 32, %s333_s13, %s1832_s21  }
  0x6a   : > { %p2092_p8 = scmp.ne.s32.totalorder %s2078_s11, 0 }
  0x6b   : > { %s1880_s20 = sand.u32 (!%p2092_p8), 1, %s1645_s25   ;;  %p2093_p11 = scmp.ne.s32.totalorder (!%p2092_p8), %s2075_s9, 0 }
  0x6c   : > { %341 = sbr.rel (%p2092_p8) target bundleno = 1156 (0x484), region = 48  ;;  %s1199_s14 = sshll.u32 (!%p2092_p8), %s1880_s20, 2 }
  0x6d   : > { %s344_s17 = scalar_lea.sflag (!%p2092_p8), [#allocation4], %s1880_s20  ;;  %s1884_s3 = scalar_lea.vmem (!%p2092_p8), [#allocation3], %s1199_s14 }
  0x71   : > { %1624 = dma.done.wait (%p2093_p11), %s344_s17, 64  }
  0x72   : > { %1626 = vsyncadd (%p2093_p11), %s344_s17, 4294967232  ;;  %s352_s19 = sand.u32 1, %s1751_s30   ;;  %s356_s21 = scalar_lea.vmem [#allocation6], %s1199_s14 }
  0x73   : > { %s353_s11 = scalar_lea.sflag [#allocation7], %s352_s19 }
  0x74   : > { %1628 = dma.done.wait (%p2093_p11), %s353_s11, 96  }
  0x75   : > { %1630 = vsyncadd (%p2093_p11), %s353_s11, 4294967200  ;;  %s1201_s18 = sshll.u32 %s1880_s20, 1  ;;  %p2094_p2 = scmp.eq.s32.totalorder %s1751_s30, 0 }
  0x76   : > { %s1896_s24 = scalar_lea.vmem [#allocation8], %s1201_s18 }
  0x77   : > { %1632 = dma.done.wait (%p2094_p2), [#allocation10], 512   ;;  %p2095_p12 = pmov %p2094_p2 }
  0x78   : > { %v1670_v0 = vmov 0.0   ;;  %vm1671_vm0 = vmmov 0   ;;  %v1416_v1 = vld [vmem:[#allocation11 + $0x8] sm:$0xff]   ;;  %v1417_v2 = vld [vmem:[#allocation11] sm:$0xff]   ;;  %v1418_v3 = vld [vmem:[#allocation9 + $0x8] sm:$0xff]   ;;  %vm443_vm1 = vcmask 261120  }
  0x79   : > { %1634 = vsyncadd (%p2095_p12), [#allocation10], 4294966784  ;;  %1248 = vmatprep.subr.bf16.mxu0 %v1670_v0  ;;  %1252 = vmatprep.mubr.msk.bf16.mxu0 %vm1671_vm0, %v1670_v0  ;;  %v1419_v4 = vld [vmem:[#allocation9] sm:$0xff]   ;;  %v419_v5 = vld [vmem:[%s356_s21] sm:$0xf]  ;;  %vm562_vm2 = vcmask 130048  }
  0x7a   : > { %1256 = vmatprep.subr.bf16.mxu1 %v1670_v0  ;;  %1260 = vmatprep.mubr.msk.bf16.mxu1 %vm1671_vm0, %v1670_v0  ;;  %v489_v6 = vld [vmem:[%s1884_s3] sm:$0xf]  ;;  %v1205_v7 = vld [vmem:[%s2054_s6] ss:$0 sm:$0xff]  ;;  %s1672_s13 = smov 96   ;;  %s1673_s26 = smov 112  }
  0x7b   : > { %1249 = vmatpush3.bf16.msra.mxu0 %v1416_v1  ;;  %1257 = vmatpush3.bf16.msra.mxu1 %v1418_v3  ;;  %v1209_v17 = vld [vmem:[%s2052_s4] ss:$0 sm:$0xff]  ;;  %s1674_s29 = smov 80   ;;  %s1675_s15 = smov 64   ;;  %vm629_vm3 = vcmask 1043456   ;;  %vm610_vm5 = vcmask 64512  }
  0x7c   : > { %1250 = vmatprep.subr.bf16.mxu0 %v1670_v0  ;;  %1258 = vmatprep.subr.bf16.mxu1 %v1670_v0  ;;  %v558_v35 = vld [vmem:[%s1896_s24] sm:$0x3]  ;;  %s1676_s16 = smov 32   ;;  %s1677_s1 = smov 16   ;;  %vm792_vm6 = vcmask 261248   ;;  %vm909_vm7 = vcmask 392448  }
  0x7d   : > { %v559_v36 = vunpack.c.0.s8 %v558_v35  ;;  %s1678_s23 = smov 48   ;;  %s1204_s10 = sshll.u32 %s1880_s20, 3  ;;  %vm1026_vm8 = vcmask 523648  }
  0x7e   : > { %s1991_s14 = scalar_lea.vmem [#allocation12], %s1204_s10  ;;  %s1223_s17 = sshll.u32 %s1653_s27, 7 }
  0x7f   : > { %1251 = vmatpush3.bf16.msra.mxu0 %v1417_v2  ;;  %1259 = vmatpush3.bf16.msra.mxu1 %v1419_v4  ;;  %vm1949_vm4 = vcmp.ne.s32.totalorder %v559_v36, 0  ;;  %s1043_s3 = sshll.u32 %s1991_s14, 4  ;;  %s2005_s21 = scalar_lea.hbm %s2055_s7, %s1223_s17  ;;  %s1044_s3 = int_to_ptr.vmem [resolvable:$true] %s1043_s3 }
  0x80   : > { %1264 = vmatprep.subr.bf16.mxu0 %v1670_v0  ;;  %1270 = vmatprep.subr.bf16.mxu1 %v1670_v0  ;;  %s1029_s18 = scalar_lea.sflag [#allocation5], %s1880_s20  ;;  %s1573_s24 = scalar_lea.vmem %s1044_s3, 128 }
  0x81   : > { %p1574_p3 = scmp.ne.s32.totalorder %s1044_s3, %s1573_s24  ;;  %p2098_p9 = scmp.ne.s32.totalorder %s2083_s22, 0 }
  0x82   : > { %1253 = vmatmul.mubr.msk.bf16.vlgmr.msra.gmra.mxu0 %vm443_vm1, %v419_v5  ;;  %1261 = vmatmul.mubr.msk.bf16.vlgmr.msra.gmra.mxu1 %vm443_vm1, %v489_v6  ;;  %s1679_s30 = smov [#allocation12]  }
  0x83   : > { %1266 = vmatprep.mubr.msk.bf16.mxu0 %vm1671_vm0, %v1670_v0  ;;  %1272 = vmatprep.mubr.msk.bf16.mxu1 %vm1671_vm0, %v1670_v0  ;;  %p1575_p0 = pnand %p1574_p3, %p2098_p9  ;;  %s1577_s9 = sshll.u32 %s1679_s30, 4  ;;  %s1578_s9 = int_to_ptr.vmem [resolvable:$false] %s1577_s9 }
  0x84   : > { %s1579_s27 = scalar_lea.vmem %s1578_s9, 256  ;;  %p1580_p10 = scmp.lt.s32.totalorder %s1044_s3, %s1578_s9 }
  0x85   : > { %p1576_p7 = pneg %p1575_p0  ;;  %p1581_p13 = scmp.lt.s32.totalorder %s1579_s27, %s1573_s24 }
  0x87   : > { %p1582_p5 = por %p1581_p13, %p1580_p10 }
  0x89   : > { %p1583_p1 = pnand %p1582_p5, %p1576_p7 }
 0x142   : > { %v481_v8 = vpop.f32.mrf.mxu0  ;;  %v551_v12 = vpop.f32.mrf.mxu1 }
 0x143   : > { %v482_v9 = vadd.f32 %v1205_v7, %v481_v8  ;;  %v552_v19 = vadd.f32 %v1209_v17, %v551_v12 }
 0x144   : > { %v1254_v10 = vpop.f32.mrf.mxu0  ;;  %v1262_v14 = vpop.f32.mrf.mxu1 }
 0x145   : > { %v487_v11 = vpack.c.bf16 %v482_v9, %v482_v9  ;;  %v557_v23 = vpack.c.bf16 %v552_v19, %v552_v19 }
 0x146   : > { %v484_v13 = vpop.f32.mrf.mxu0  ;;  %v554_v16 = vpop.f32.mrf.mxu1 }
 0x147   : > { %488 = vst [vmem:[#allocation2] sm:$0xf] %v487_v11 }
 0x148   : > { %v1255_v15 = vpop.f32.mrf.mxu0  ;;  %v1263_v18 = vpop.f32.mrf.mxu1 }
 0x14e   : > { %v561_v20 = vld [vmem:[#allocation2] sm:$0xf] }
 0x14f   : > { %v567_v21 = vsel %vm562_vm2, %v561_v20, 0  ;;  %v1924_v22 = vcombine.low %v561_v20, %v561_v20 }
 0x150   : > { %1265 = vmatpush3.bf16.xpose.msra.mxu0 %v567_v21 }
 0x151   : > { %796 = vrot.lane.b32.xlu1 %v1924_v22, %s1672_s13  ;;  %679 = vrot.lane.b32.xlu0 %v1924_v22, %s1673_s26 }
 0x152   : > { %1276 = vmatprep.subr.bf16.mxu0 %v1670_v0 }
 0x155   : > { %794 = vrot.lane.b32.xlu1 %v557_v23, %s1672_s13  ;;  %677 = vrot.lane.b32.xlu0 %v557_v23, %s1673_s26 }
 0x157   : > { %1267 = vmatmul.mubr.msk.bf16.vlgmr.msra.gmra.mxu0 %vm562_vm2, %v557_v23 }
 0x158   : > { %1278 = vmatprep.mubr.msk.bf16.mxu0 %vm1671_vm0, %v1670_v0 }
 0x159   : > { %911 = vrot.lane.b32.xlu1 %v557_v23, %s1674_s29  ;;  %913 = vrot.lane.b32.xlu0 %v1924_v22, %s1674_s29 }
 0x15d   : > { %624 = vrot.lane.b32.xlu1 %v1924_v22, %s1675_s15 }
 0x1c3   : > { %v797_v24 = vpop.permute.xlu1 %796  ;;  %v680_v25 = vpop.permute.xlu0 %679 }
 0x1c4   : > { %v685_v26 = vsel %vm562_vm2, %v680_v25, 0  ;;  %v802_v30 = vsel %vm562_vm2, %v797_v24, 0 }
 0x1c5   : > { %1277 = vmatpush3.bf16.xpose.msra.mxu0 %v685_v26 }
 0x1c6   : > { %1288 = vmatprep.subr.bf16.mxu0 %v1670_v0 }
 0x1c7   : > { %v795_v27 = vpop.permute.xlu1 %794  ;;  %v678_v28 = vpop.permute.xlu0 %677 }
 0x1cb   : > { %v912_v29 = vpop.permute.xlu1 %911  ;;  %v914_v33 = vpop.permute.xlu0 %913 }
 0x1cc   : > { %1279 = vmatmul.mubr.msk.bf16.vlgmr.msra.gmra.mxu0 %vm562_vm2, %v678_v28  ;;  %v919_v34 = vsel %vm562_vm2, %v914_v33, 0 }
 0x1cd   : > { %1289 = vmatpush3.bf16.xpose.msra.mxu0 %v802_v30  ;;  %1290 = vmatprep.mubr.msk.bf16.mxu0 %vm1671_vm0, %v1670_v0 }
 0x1ce   : > { %1300 = vmatprep.subr.bf16.mxu0 %v1670_v0 }
 0x1cf   : > { %v625_v31 = vpop.permute.xlu1 %624 }
 0x1d0   : > { %v631_v32 = vsel %vm629_vm3, %v625_v31, 0 }
 0x1d1   : > { %1271 = vmatpush3.bf16.msra.mxu1 %v631_v32 }
 0x1d2   : > { %1282 = vmatprep.subr.bf16.mxu1 %v1670_v0 }
 0x1d4   : > { %1291 = vmatmul.mubr.msk.bf16.vlgmr.msra.gmra.mxu0 %vm562_vm2, %v795_v27 }
 0x1d5   : > { %1301 = vmatpush3.bf16.xpose.msra.mxu0 %v919_v34  ;;  %1302 = vmatprep.mubr.msk.bf16.mxu0 %vm1671_vm0, %v1670_v0 }
 0x1dc   : > { %1303 = vmatmul.mubr.msk.bf16.vlgmr.msra.gmra.mxu0 %vm562_vm2, %v912_v29 }
 0x217   : > { %v603_v38 = vpop.f32.mrf.mxu0 }
 0x218   : > { %v609_v39 = vsel %vm1949_vm4, -1e+09, %v603_v38 }
 0x219   : > { %v1268_v40 = vpop.f32.mrf.mxu0  ;;  %v611_v41 = vsel %vm610_vm5, %v609_v39, -inf }
 0x21a   : > { %612 = vmax.xlane.f32.xlu0 %v611_v41 }
 0x21b   : > { %v606_v42 = vpop.f32.mrf.mxu0 }
 0x21d   : > { %v1269_v43 = vpop.f32.mrf.mxu0 }
 0x28c   : > { %v721_v44 = vpop.f32.mrf.mxu0 }
 0x28d   : > { %v727_v45 = vsel %vm1949_vm4, -1e+09, %v721_v44 }
 0x28e   : > { %v1280_v46 = vpop.f32.mrf.mxu0  ;;  %v728_v47 = vsel %vm610_vm5, %v727_v45, -inf }
 0x28f   : > { %729 = vmax.xlane.f32.xlu1 %v728_v47 }
 0x290   : > { %v724_v48 = vpop.f32.mrf.mxu0 }
 0x292   : > { %v1281_v49 = vpop.f32.mrf.mxu0 }
 0x294   : > { %v838_v50 = vpop.f32.mrf.mxu0 }
 0x295   : > { %v844_v51 = vsel %vm1949_vm4, -1e+09, %v838_v50 }
 0x296   : > { %v1292_v52 = vpop.f32.mrf.mxu0  ;;  %v845_v53 = vsel %vm610_vm5, %v844_v51, -inf }
 0x297   : > { %846 = vmax.xlane.f32.xlu0 %v845_v53 }
 0x298   : > { %v841_v54 = vpop.f32.mrf.mxu0 }
 0x29a   : > { %v1293_v55 = vpop.f32.mrf.mxu0 }
 0x29c   : > { %v955_v56 = vpop.f32.mrf.mxu0 }
 0x29d   : > { %v961_v57 = vsel %vm1949_vm4, -1e+09, %v955_v56 }
 0x29e   : > { %v1304_v58 = vpop.f32.mrf.mxu0  ;;  %v962_v59 = vsel %vm610_vm5, %v961_v57, -inf }
 0x29f   : > { %963 = vmax.xlane.f32.xlu0 %v962_v59 }
 0x2a0   : > { %855 = vrot.lane.b32.xlu1 %v1924_v22, %s1676_s16  ;;  %v958_v60 = vpop.f32.mrf.mxu0 }
 0x2a2   : > { %v1305_v61 = vpop.f32.mrf.mxu0 }
 0x2a3   : > { %v613_v62 = vpop.xlane.xlu0 %612 }
 0x2a4   : > { %v614_v63 = vsub.f32 %v609_v39, %v613_v62  ;;  %972 = vrot.lane.b32.xlu1 %v1924_v22, %s1677_s1 }
 0x2a6   : > { %v615_v1 = vmul.f32 1.442695, %v614_v63 }
 0x2a8   : > { %1421 = vpow2.f32 %v615_v1 }
 0x2b5   : > { %v1422_v2 = vpop.eup %1421  ;;  %738 = vrot.lane.b32.xlu0 %v1924_v22, %s1678_s23 }
 0x2b6   : > { %v620_v3 = vpack.c.bf16 %v1422_v2, %v1422_v2  ;;  %v617_v27 = vsel %vm610_vm5, %v1422_v2, 0.0 }
 0x2b8   : > { %1273 = vmatmul.mubr.msk.bf16.vlgmr.msra.gmra.mxu1 %vm610_vm5, %v620_v3 }
 0x2b9   : > { %1284 = vmatprep.mubr.msk.bf16.mxu1 %vm1671_vm0, %v1670_v0 }
 0x318   : > { %v730_v4 = vpop.xlane.xlu1 %729 }
 0x319   : > { %v731_v5 = vsub.f32 %v727_v45, %v730_v4 }
 0x31b   : > { %v732_v6 = vmul.f32 1.442695, %v731_v5 }
 0x31c   : > { %v856_v17 = vpop.permute.xlu1 %855 }
 0x31d   : > { %1423 = vpow2.f32 %v732_v6  ;;  %v861_v19 = vsel %vm629_vm3, %v856_v17, 0 }
 0x320   : > { %v847_v7 = vpop.xlane.xlu0 %846  ;;  %v973_v22 = vpop.permute.xlu1 %972 }
 0x321   : > { %v848_v8 = vsub.f32 %v844_v51, %v847_v7  ;;  %v978_v24 = vsel %vm629_vm3, %v973_v22, 0 }
 0x323   : > { %v849_v9 = vmul.f32 1.442695, %v848_v8 }
 0x325   : > { %1425 = vpow2.f32 %v849_v9 }
 0x328   : > { %v964_v10 = vpop.xlane.xlu0 %963 }
 0x329   : > { %v965_v11 = vsub.f32 %v961_v57, %v964_v10 }
 0x32a   : > { %v1424_v12 = vpop.eup %1423 }
 0x32b   : > { %v966_v13 = vmul.f32 1.442695, %v965_v11  ;;  %v734_v14 = vsel %vm610_vm5, %v1424_v12, 0.0  ;;  %v737_v18 = vpack.c.bf16 %v1424_v12, %v1424_v12 }
 0x32c   : > { %735 = vadd.xlane.f32.xlu0 %v734_v14  ;;  %v739_v15 = vpop.permute.xlu0 %738 }
 0x32d   : > { %1427 = vpow2.f32 %v966_v13  ;;  %v744_v16 = vsel %vm629_vm3, %v739_v15, 0 }
 0x32e   : > { %1283 = vmatpush3.bf16.msra.mxu1 %v744_v16 }
 0x32f   : > { %1294 = vmatprep.subr.bf16.mxu1 %v1670_v0 }
 0x331   : > { %1285 = vmatmul.mubr.msk.bf16.vlgmr.msra.gmra.mxu1 %vm610_vm5, %v737_v18 }
 0x332   : > { %v1426_v20 = vpop.eup %1425  ;;  %1295 = vmatpush3.bf16.msra.mxu1 %v861_v19  ;;  %1296 = vmatprep.mubr.msk.bf16.mxu1 %vm1671_vm0, %v1670_v0 }
 0x333   : > { %v851_v21 = vsel %vm610_vm5, %v1426_v20, 0.0  ;;  %1306 = vmatprep.subr.bf16.mxu1 %v1670_v0  ;;  %v854_v23 = vpack.c.bf16 %v1426_v20, %v1426_v20 }
 0x334   : > { %852 = vadd.xlane.f32.xlu1 %v851_v21 }
 0x339   : > { %1297 = vmatmul.mubr.msk.bf16.vlgmr.msra.gmra.mxu1 %vm610_vm5, %v854_v23 }
 0x33a   : > { %v1428_v25 = vpop.eup %1427  ;;  %1307 = vmatpush3.bf16.msra.mxu1 %v978_v24  ;;  %1308 = vmatprep.mubr.msk.bf16.mxu1 %vm1671_vm0, %v1670_v0 }
 0x33b   : > { %v968_v26 = vsel %vm610_vm5, %v1428_v25, 0.0  ;;  %v971_v28 = vpack.c.bf16 %v1428_v25, %v1428_v25 }
 0x33c   : > { %969 = vadd.xlane.f32.xlu0 %v968_v26 }
 0x340   : > { %618 = vadd.xlane.f32.xlu0 %v617_v27 }
 0x341   : > { %1309 = vmatmul.mubr.msk.bf16.vlgmr.msra.gmra.mxu1 %vm610_vm5, %v971_v28 }
 0x378   : > { %v667_v29 = vpop.f32.mrf.mxu1 }
 0x37a   : > { %v1274_v30 = vpop.f32.mrf.mxu1 }
 0x37c   : > { %v670_v31 = vpop.f32.mrf.mxu1 }
 0x37e   : > { %v1275_v32 = vpop.f32.mrf.mxu1 }
 0x3b5   : > { %v736_v33 = vpop.xlane.xlu0 %735 }
 0x3bd   : > { %v853_v37 = vpop.xlane.xlu1 %852 }
 0x3c5   : > { %v970_v34 = vpop.xlane.xlu0 %969 }
 0x3c9   : > { %v619_v35 = vpop.xlane.xlu0 %618 }
 0x3ca   : > { %1429 = vrcp.f32 %v619_v35 }
 0x3cb   : > { %1431 = vrcp.f32 %v736_v33 }
 0x3cc   : > { %1433 = vrcp.f32 %v853_v37 }
 0x3cd   : > { %1435 = vrcp.f32 %v970_v34 }
 0x3d7   : > { %v1430_v36 = vpop.eup %1429 }
 0x3d8   : > { %v674_v0 = vmul.f32 %v1430_v36, %v667_v29  ;;  %v1432_v38 = vpop.eup %1431 }
 0x3d9   : > { %v1434_v44 = vpop.eup %1433 }
 0x3da   : > { %675 = vst.msk [vmem:[%s1991_s14] sm:$0xff] %vm562_vm2, %v674_v0  ;;  %v1436_v50 = vpop.eup %1435 }
 0x3f1   : > { %v780_v39 = vpop.f32.mrf.mxu1 }
 0x3f2   : > { %v787_v40 = vmul.f32 %v1432_v38, %v780_v39 }
 0x3f3   : > { %v1286_v41 = vpop.f32.mrf.mxu1 }
 0x3f4   : > { %789 = vrot.lane.b32.xlu1 %v787_v40, %s1677_s1 }
 0x3f5   : > { %v783_v42 = vpop.f32.mrf.mxu1 }
 0x3f7   : > { %v1287_v43 = vpop.f32.mrf.mxu1 }
 0x3f9   : > { %v897_v45 = vpop.f32.mrf.mxu1 }
 0x3fa   : > { %v904_v46 = vmul.f32 %v1434_v44, %v897_v45 }
 0x3fb   : > { %v1298_v47 = vpop.f32.mrf.mxu1 }
 0x3fc   : > { %906 = vrot.lane.b32.xlu0 %v904_v46, %s1676_s16 }
 0x3fd   : > { %v900_v48 = vpop.f32.mrf.mxu1 }
 0x3ff   : > { %v1299_v49 = vpop.f32.mrf.mxu1 }
 0x401   : > { %v1014_v51 = vpop.f32.mrf.mxu1 }
 0x402   : > { %v1021_v52 = vmul.f32 %v1436_v50, %v1014_v51 }
 0x403   : > { %v1310_v53 = vpop.f32.mrf.mxu1 }
 0x404   : > { %1023 = vrot.lane.b32.xlu1 %v1021_v52, %s1678_s23 }
 0x405   : > { %v1017_v54 = vpop.f32.mrf.mxu1 }
 0x407   : > { %v1311_v55 = vpop.f32.mrf.mxu1 }
 0x466   : > { %v790_v56 = vpop.permute.xlu1 %789 }
 0x467   : > { %793 = vst.msk [vmem:[%s1991_s14] sm:$0xff] %vm792_vm6, %v790_v56 }
 0x46e   : > { %v907_v57 = vpop.permute.xlu0 %906 }
 0x46f   : > { %910 = vst.msk [vmem:[%s1991_s14] sm:$0xff] %vm909_vm7, %v907_v57 }
 0x476   : > { %v1024_v58 = vpop.permute.xlu1 %1023 }
 0x477   : > { %1027 = vst.msk [vmem:[%s1991_s14] sm:$0xff] %vm1026_vm8, %v1024_v58 }
 0x478   : > { %1586 = shalt.err (!%p1583_p1)
}
 0x479   : > { %s1587_s8 = scalar_lea.hbm %s2005_s21, 128  ;;  %s1591_s13 = scalar_lea.hbm %s2055_s7, 256 }
 0x47a   : > { %p1588_p4 = scmp.ne.s32.totalorder %s2005_s21, %s1587_s8  ;;  %p1592_p11 = scmp.lt.s32.totalorder %s2005_s21, %s2055_s7 }
 0x47b   : > { %p1593_p2 = scmp.lt.s32.totalorder %s1591_s13, %s1587_s8 }
 0x47c   : > { %p1589_p6 = pnand %p1588_p4, %p2098_p9 }
 0x47d   : > { %p1594_p12 = por %p1593_p2, %p1592_p11 }
 0x47e   : > { %p1590_p8 = pneg %p1589_p6 }
 0x480   : > { %p1595_p3 = pnand %p1594_p12, %p1590_p8 }
 0x482   : > { %1598 = shalt.err (!%p1595_p3)
}
 0x483   : > { %1326 = dma.vmem_to_hbm [thread:$0]  (%p2098_p9), %s1044_s3, 128, %s2005_s21, %s1029_s18  }
 0x484 PF: > { %s2099_s15 = sld [smem:[#allocation17_spill]] }
 0x485   : > { %s2100_s16 = sld [smem:[#allocation20_spill]] }
 0x486   : > { %s2101_s1 = sld [smem:[#allocation19_spill]] }
 0x48a   : > { %s1055_s23 = sand.u32 1, %s2099_s15  }
 0x48b   : > { %p2102_p0 = scmp.ne.s32.totalorder %s2100_s16, 0  ;;  %s1056_s10 = scalar_lea.sflag [#allocation5], %s1055_s23 }
 0x48c   : > { %p2103_p7 = scmp.ge.s32.totalorder %s2101_s1, 2 }
 0x48e   : > { %p1346_p10 = pnand %p2103_p7, %p2102_p0 }
 0x490   : > { %p1347_p13 = pneg %p1346_p10 }
 0x492   : > { %1636 = dma.done.wait (%p1347_p13), %s1056_s10, 128  }
 0x493   : > { %1638 = vsyncadd (%p1347_p13), %s1056_s10, 4294967168  ;;  %s27_s29 = sadd.s32 1, %s2101_s1   ;;  %s2104_s14 = sld [smem:[#allocation18_spill]] }
 0x494   : > { %p24_p5 = scmp.ge.s32.totalorder %s27_s29, 4   ;;  %s2105_s26 = sld [smem:[#allocation22_spill]] }
 0x495   : > { %s2106_s22 = sld [smem:[#allocation21_spill]]  ;;  %s2107_s24 = smov %s1645_s25 }
 0x496   : > { %s2109_s27 = smov %s1657_s28 }
 0x497   :  { %26 = sbr.rel (!%p24_p5) target bundleno = 12 (0xc), region = 129 }
 0x499   : > { %s2108_s25 = smov %s2104_s14 }
 0x49b   : > { %s2110_s28 = smov %s2106_s22 }
 0x49c   :  { %1061 = vsyncpa [#allocation4], 1 }
 0x49d   :  { %1063 = vsyncpa [#allocation4 + $0x1], 1 }
 0x49e   :  { %1064 = vsyncpa [#allocation7], 1 }
 0x49f   :  { %1066 = vsyncpa [#allocation7 + $0x1], 1 }
 0x4a0   :  { %1067 = vsyncpa [#allocation10], 1 }
 0x4a1   :  { %1068 = vsyncpa [#allocation5], 1 }
 0x4a2   :  { %1070 = vsyncpa [#allocation5 + $0x1], 1 }

// kernel: tpu_custom_call.1
= control target key start
LH: loop header
LB: loop body
LE: loop exit
PB: predicated region body
PF: predicated region fallthrough
CT: control target
= control target key end

     0   :  { %s2048_s0 = inlined_call_operand.hbm [shape: bf16[2,8,32], index: 0, kind: input, shape index: {}]   ;;  %s2049_s1 = inlined_call_operand.hbm [shape: bf16[2,8,32], index: 1, kind: input, shape index: {}]   ;;  %s2050_s2 = inlined_call_operand.hbm [shape: s8[2,8,8], index: 2, kind: input, shape index: {}]   ;;  %s2051_s3 = inlined_call_operand.hbm [shape: bf16[32,64], index: 3, kind: input, shape index: {}]   ;;  %s2052_s4 = inlined_call_operand.vmem [shape: f32[1,64], index: 4, kind: input, shape index: {}]   ;;  %s2053_s5 = inlined_call_operand.hbm [shape: bf16[32,128], index: 5, kind: input, shape index: {}]   ;;  %s2054_s6 = inlined_call_operand.vmem [shape: f32[1,128], index: 6, kind: input, shape index: {}]   ;;  %s2055_s7 = inlined_call_operand.hbm [shape: f32[2,8,64], index: 7, kind: output, shape index: {}]  }
   0x1   :  { %2070 = sst [smem:[#allocation23_spill]] %s2049_s1 }
   0x2   :  { %2071 = sst [smem:[#allocation24_spill]] %s2051_s3 }
   0x3   :  { %12 = vsyncpa [#allocation4], 0 }
   0x4   :  { %14 = vsyncpa [#allocation4 + $0x1], 0 }
   0x5   :  { %15 = vsyncpa [#allocation7], 0 }
   0x6   :  { %17 = vsyncpa [#allocation7 + $0x1], 0 }
   0x7   :  { %18 = vsyncpa [#allocation10], 0 }
   0x8   :  { %19 = vsyncpa [#allocation5], 0 }
   0x9   :  { %21 = vsyncpa [#allocation5 + $0x1], 0  ;;  %s1720_s24 = smov 0   ;;  %s1722_s25 = smov 0  }
   0xa   :  { %s1724_s26 = smov 0   ;;  %s1726_s27 = smov 0  }
   0xb   :  { %s1728_s28 = smov 0   ;;  %s1730_s29 = smov 0  }
   0xc LB: > { %2072 = sst [smem:[#allocation17_spill]] %s1641_s24  ;;  %s1751_s30 = sadd.s32 4294967295, %s1661_s29   ;;  %s1661_s29 = sphi %s1730_s29, %s27_s29   ;;  %s1657_s28 = sphi %s1728_s28, %s2110_s28   ;;  %s1653_s27 = sphi %s1726_s27, %s2109_s27   ;;  %s1649_s26 = sphi %s1724_s26, %s2105_s26   ;;  %s1645_s25 = sphi %s1722_s25, %s2108_s25   ;;  %s1641_s24 = sphi %s1720_s24, %s2107_s24  }
   0xd   : > { %2073 = sst [smem:[#allocation18_spill]] %s1649_s26  ;;  %s1187_s8 = sadd.s32 4294967294, %s1661_s29  }
   0xe   : > { %2074 = sst [smem:[#allocation19_spill]] %s1661_s29  ;;  %p61_p0 = scmp.ne.s32.totalorder %s1645_s25, %s1641_s24 }
   0xf   : > { %p2064_p1 = scmp.eq.s32.totalorder %s1751_s30, 0  ;;  %p231_p3 = scmp.eq.s32.totalorder %s1187_s8, 1 }
  0x10   : > { %p1188_p5 = scmp.ge.s32.totalorder %s1661_s29, 1  ;;  %p238_p7 = scmp.lt.s32.totalorder %s1661_s29, 3 }
  0x11   : > { %p1760_p4 = por %p2064_p1, %p61_p0  ;;  %p1765_p6 = por %p231_p3, %p61_p0 }
  0x12   : > { %p1770_p8 = pnand %p1188_p5, %p238_p7  ;;  %s1663_s12 = smov [#allocation9]  }
  0x13   : > { %s2075_s9 = scalar_select %p1760_p4, 1, 0 }
  0x14   : > { %s2076_s10 = scalar_select %p1765_p6, 1, 0 }
  0x15   : > { %s2078_s11 = scalar_select %p1770_p8, 1, 0 }
  0x16   : > { %2077 = sst [smem:[#allocation20_spill]] %s2076_s10  ;;  %s250_s13 = sshll.u32 %s1663_s12, 4  ;;  %s251_s13 = int_to_ptr.vmem [resolvable:$true] %s250_s13 }
  0x17   : > { %p1328_p9 = pneg %p1770_p8  ;;  %s39_s15 = sadd.s32 1, %s1657_s28 }
  0x18   : > { %s1448_s16 = scalar_lea.vmem %s251_s13, 256  ;;  %p1456_p5 = scmp.lt.s32.totalorder %s251_s13, %s251_s13 }
  0x19   : > { %p1779_p11 = pnand %p1328_p9, %p2064_p1  ;;  %p1449_p13 = scmp.ne.s32.totalorder %s251_s13, %s1448_s16 }
  0x1a   : > { %p1457_p7 = scmp.lt.s32.totalorder %s1448_s16, %s1448_s16 }
  0x1b   : > { %p2065_p12 = pneg %p1779_p11 }
  0x1c   : > { %p1458_p2 = por %p1457_p7, %p1456_p5 }
  0x1d   : > { %p1451_p0 = pnand %p1449_p13, %p2065_p12 }
  0x1f   : > { %p1452_p3 = pneg %p1451_p0 }
  0x21   : > { %p1459_p10 = pnand %p1458_p2, %p1452_p3 }
  0x23   : > { %1462 = shalt.err (!%p1459_p10)
}
  0x24   : > { %s2056_s17 = smov 64   ;;  %s2057_s18 = smov 4  }
  0x25   : > { %s2080_s3 = sld [smem:[#allocation24_spill]]  ;;  %p41_p2 = scmp.ge.s32.totalorder %s39_s15, 2 }
  0x26   : > { %s48_s21 = sadd.s32 1, %s1649_s26  ;;  %p55_p9 = scmp.ne.s32.totalorder %s1649_s26, %s1645_s25 }
  0x27   : > { %p56_p10 = scmp.eq.s32.totalorder %s1661_s29, 0  ;;  %s2112_s15 = smov (%p41_p2, %s39_s15), 0 }
  0x28   : > { %2081 = sst [smem:[#allocation21_spill]] %s2112_s15  ;;  %p2082_p0 = scmp.eq.s32.totalorder %s1751_s30, 1 }
  0x29   : > { %p57_p13 = por %p56_p10, %p55_p9  ;;  %s43_s23 = ssub.s32 %s1657_s28, %s2112_s15 }
  0x2a   : > { %p1805_p3 = por %p2082_p0, %p55_p9  ;;  %p1351_p5 = scmp.lt.s32.totalorder %s1661_s29, 2 }
  0x2b   : > { %1331 = dma.hbm_to_vmem [thread:$0]  (!%p1779_p11), %s2080_s3, 256, %s251_s13, [#allocation10], %s2056_s17, %s2056_s17, %s2057_s18  }
  0x2c   : > { %s2083_s22 = scalar_select %p1805_p3, 1, 0 }
  0x2d   : > { %p46_p7 = scmp.eq.s32.totalorder %s43_s23, 0  ;;  %s1813_s8 = sand.u32 1, %s1649_s26  }
  0x2e   : > { %s1192_s12 = sshll.u32 %s1813_s8, 2  ;;  %s1193_s13 = sshll.u32 %s1657_s28, 6 }
  0x2f   : > { %s1818_s16 = scalar_select %p46_p7, %s1649_s26, %s48_s21  }
  0x30   : > { %p1820_p2 = pnand %p1351_p5, %p57_p13  ;;  %s302_s20 = sand.u32 1, %s1661_s29  }
  0x31   : > { %2084 = sst [smem:[#allocation22_spill]] %s1818_s16  ;;  %s306_s3 = scalar_lea.vmem [#allocation6], %s1192_s12 }
  0x32   : > { %s2086_s1 = sld [smem:[#allocation23_spill]]  ;;  %s313_s15 = sshll.u32 %s306_s3, 4  ;;  %s314_s15 = int_to_ptr.vmem [resolvable:$true] %s313_s15 }
  0x33   : > { %s1666_s10 = smov [#allocation11]   ;;  %s1832_s21 = scalar_lea.sflag [#allocation7], %s302_s20 }
  0x34   : > { %s266_s24 = sshll.u32 %s1666_s10, 4  ;;  %p2066_p9 = pneg %p1820_p2  ;;  %s267_s24 = int_to_ptr.vmem [resolvable:$true] %s266_s24 }
  0x35   : > { %s1476_s16 = scalar_lea.vmem %s314_s15, 64  ;;  %s1667_s26 = smov [#allocation6]  }
  0x36   : > { %p1477_p10 = scmp.ne.s32.totalorder %s314_s15, %s1476_s16  ;;  %s1481_s29 = sshll.u32 %s1667_s26, 4  ;;  %s1482_s29 = int_to_ptr.vmem [resolvable:$false] %s1481_s29 }
  0x37   : > { %s1483_s17 = scalar_lea.vmem %s1482_s29, 128  ;;  %p1484_p5 = scmp.lt.s32.totalorder %s314_s15, %s1482_s29 }
  0x38   : > { %s311_s23 = scalar_lea.hbm %s2086_s1, %s1193_s13  ;;  %p1479_p13 = pnand %p1477_p10, %p2066_p9 }
  0x39   : > { %p1485_p7 = scmp.lt.s32.totalorder %s1483_s17, %s1476_s16 }
  0x3a   : > { %p1480_p0 = pneg %p1479_p13 }
  0x3b   : > { %p1486_p1 = por %p1485_p7, %p1484_p5 }
  0x3d   : > { %p1487_p12 = pnand %p1486_p1, %p1480_p0 }
  0x3f   : > { %1490 = shalt.err (!%p1487_p12)
}
  0x40   : > { %1341 = dma.hbm_to_vmem [thread:$0]  (!%p1820_p2), %s311_s23, 64, %s314_s15, %s1832_s21  }
  0x41   : > { %s1502_s3 = scalar_lea.vmem %s267_s24, 256  ;;  %p2087_p10 = pneg %p1779_p11 }
  0x42   : > { %p1503_p6 = scmp.ne.s32.totalorder %s267_s24, %s1502_s3  ;;  %p1510_p3 = scmp.lt.s32.totalorder %s267_s24, %s267_s24 }
  0x43   : > { %p1511_p4 = scmp.lt.s32.totalorder %s1502_s3, %s1502_s3 }
  0x44   : > { %p1505_p13 = pnand %p1503_p6, %p2087_p10 }
  0x45   : > { %p1512_p8 = por %p1511_p4, %p1510_p3 }
  0x46   : > { %p1506_p9 = pneg %p1505_p13 }
  0x48   : > { %p1513_p5 = pnand %p1512_p8, %p1506_p9 }
  0x4a   : > { %1516 = shalt.err (!%p1513_p5)
}
  0x4b   : > { %s2088_s26 = smov 4   ;;  %s2089_s29 = smov 64  }
  0x4c   : > { %1334 = dma.hbm_to_vmem [thread:$0]  (!%p1779_p11), %s2053_s5, 256, %s267_s24, [#allocation10], %s2089_s29, %s2089_s29, %s2088_s26  }
  0x4d   : > { %s293_s20 = scalar_lea.hbm %s2048_s0, %s1193_s13  ;;  %s287_s23 = scalar_lea.vmem [#allocation3], %s1192_s12 }
  0x4e   : > { %s295_s14 = sshll.u32 %s287_s23, 4  ;;  %s1196_s17 = sshll.u32 %s1813_s8, 1  ;;  %s296_s14 = int_to_ptr.vmem [resolvable:$true] %s295_s14 }
  0x4f   : > { %s284_s3 = scalar_lea.sflag [#allocation4], %s1813_s8  ;;  %s1530_s1 = scalar_lea.vmem %s296_s14, 64 }
  0x50   : > { %p1531_p1 = scmp.ne.s32.totalorder %s296_s14, %s1530_s1  ;;  %p2090_p4 = pneg %p1820_p2 }
  0x51   : > { %s1668_s10 = smov [#allocation3]  }
  0x52   : > { %p1533_p6 = pnand %p1531_p1, %p2090_p4  ;;  %s1535_s18 = sshll.u32 %s1668_s10, 4  ;;  %s1536_s18 = int_to_ptr.vmem [resolvable:$false] %s1535_s18 }
  0x53   : > { %s1537_s24 = scalar_lea.vmem %s1536_s18, 128  ;;  %p1538_p11 = scmp.lt.s32.totalorder %s296_s14, %s1536_s18 }
  0x54   : > { %p1534_p8 = pneg %p1533_p6  ;;  %p1539_p12 = scmp.lt.s32.totalorder %s1537_s24, %s1530_s1 }
  0x56   : > { %p1540_p3 = por %p1539_p12, %p1538_p11 }
  0x58   : > { %p1541_p9 = pnand %p1540_p3, %p1534_p8 }
  0x5a   : > { %1544 = shalt.err (!%p1541_p9)
}
  0x5b   : > { %1338 = dma.hbm_to_vmem [thread:$0]  (!%p1820_p2), %s293_s20, 64, %s296_s14, %s284_s3  }
  0x5c   : > { %s1197_s8 = sshll.u32 %s1657_s28, 5  ;;  %s324_s12 = scalar_lea.vmem [#allocation8], %s1196_s17 }
  0x5d   : > { %s332_s13 = sshll.u32 %s324_s12, 4  ;;  %s330_s15 = scalar_lea.hbm %s2050_s2, %s1197_s8  ;;  %s333_s13 = int_to_ptr.vmem [resolvable:$true] %s332_s13 }
  0x5e   : > { %s1558_s16 = scalar_lea.vmem %s333_s13, 32  ;;  %p2091_p7 = pmov %p2090_p4 }
  0x5f   : > { %p1559_p0 = scmp.ne.s32.totalorder %s333_s13, %s1558_s16  ;;  %s1669_s1 = smov [#allocation8]  }
  0x60   : > { %s1563_s23 = sshll.u32 %s1669_s1, 4  ;;  %s1564_s23 = int_to_ptr.vmem [resolvable:$false] %s1563_s23 }
  0x61   : > { %p1561_p10 = pnand %p1559_p0, %p2091_p7  ;;  %s1565_s10 = scalar_lea.vmem %s1564_s23, 64 }
  0x62   : > { %p1566_p5 = scmp.lt.s32.totalorder %s333_s13, %s1564_s23  ;;  %p1567_p1 = scmp.lt.s32.totalorder %s1565_s10, %s1558_s16 }
  0x63   : > { %p1562_p13 = pneg %p1561_p10 }
  0x64   : > { %p1568_p4 = por %p1567_p1, %p1566_p5 }
  0x66   : > { %p1569_p6 = pnand %p1568_p4, %p1562_p13 }
  0x68   : > { %1572 = shalt.err (!%p1569_p6)
}
  0x69   : > { %1344 = dma.hbm_to_vmem [thread:$0]  (!%p1820_p2), %s330_s15, 32, %s333_s13, %s1832_s21  }
  0x6a   : > { %p2092_p8 = scmp.ne.s32.totalorder %s2078_s11, 0 }
  0x6b   : > { %s1880_s20 = sand.u32 (!%p2092_p8), 1, %s1645_s25   ;;  %p2093_p11 = scmp.ne.s32.totalorder (!%p2092_p8), %s2075_s9, 0 }
  0x6c   : > { %341 = sbr.rel (%p2092_p8) target bundleno = 1156 (0x484), region = 48  ;;  %s1199_s14 = sshll.u32 (!%p2092_p8), %s1880_s20, 2 }
  0x6d   : > { %s344_s17 = scalar_lea.sflag (!%p2092_p8), [#allocation4], %s1880_s20  ;;  %s1884_s3 = scalar_lea.vmem (!%p2092_p8), [#allocation3], %s1199_s14 }
  0x71   : > { %1624 = dma.done.wait (%p2093_p11), %s344_s17, 64  }
  0x72   : > { %1626 = vsyncadd (%p2093_p11), %s344_s17, 4294967232  ;;  %s352_s19 = sand.u32 1, %s1751_s30   ;;  %s356_s21 = scalar_lea.vmem [#allocation6], %s1199_s14 }
  0x73   : > { %s353_s11 = scalar_lea.sflag [#allocation7], %s352_s19 }
  0x74   : > { %1628 = dma.done.wait (%p2093_p11), %s353_s11, 96  }
  0x75   : > { %1630 = vsyncadd (%p2093_p11), %s353_s11, 4294967200  ;;  %s1201_s18 = sshll.u32 %s1880_s20, 1  ;;  %p2094_p2 = scmp.eq.s32.totalorder %s1751_s30, 0 }
  0x76   : > { %s1896_s24 = scalar_lea.vmem [#allocation8], %s1201_s18 }
  0x77   : > { %1632 = dma.done.wait (%p2094_p2), [#allocation10], 512   ;;  %p2095_p12 = pmov %p2094_p2 }
  0x78   : > { %v1670_v0 = vmov 0.0   ;;  %vm1671_vm0 = vmmov 0   ;;  %v1416_v1 = vld [vmem:[#allocation11 + $0x8] sm:$0xff]   ;;  %v1417_v2 = vld [vmem:[#allocation11] sm:$0xff]   ;;  %v1418_v3 = vld [vmem:[#allocation9 + $0x8] sm:$0xff]   ;;  %vm443_vm1 = vcmask 261120  }
  0x79   : > { %1634 = vsyncadd (%p2095_p12), [#allocation10], 4294966784  ;;  %1248 = vmatprep.subr.bf16.mxu0 %v1670_v0  ;;  %1252 = vmatprep.mubr.msk.bf16.mxu0 %vm1671_vm0, %v1670_v0  ;;  %v1419_v4 = vld [vmem:[#allocation9] sm:$0xff]   ;;  %v419_v5 = vld [vmem:[%s356_s21] sm:$0xf]  ;;  %vm562_vm2 = vcmask 130048  }
  0x7a   : > { %1256 = vmatprep.subr.bf16.mxu1 %v1670_v0  ;;  %1260 = vmatprep.mubr.msk.bf16.mxu1 %vm1671_vm0, %v1670_v0  ;;  %v489_v6 = vld [vmem:[%s1884_s3] sm:$0xf]  ;;  %v1205_v7 = vld [vmem:[%s2054_s6] ss:$0 sm:$0xff]  ;;  %s1672_s13 = smov 96   ;;  %s1673_s26 = smov 112  }
  0x7b   : > { %1249 = vmatpush3.bf16.msra.mxu0 %v1416_v1  ;;  %1257 = vmatpush3.bf16.msra.mxu1 %v1418_v3  ;;  %v1209_v17 = vld [vmem:[%s2052_s4] ss:$0 sm:$0xff]  ;;  %s1674_s29 = smov 80   ;;  %s1675_s15 = smov 64   ;;  %vm629_vm3 = vcmask 1043456   ;;  %vm610_vm5 = vcmask 64512  }
  0x7c   : > { %1250 = vmatprep.subr.bf16.mxu0 %v1670_v0  ;;  %1258 = vmatprep.subr.bf16.mxu1 %v1670_v0  ;;  %v558_v35 = vld [vmem:[%s1896_s24] sm:$0x3]  ;;  %s1676_s16 = smov 32   ;;  %s1677_s1 = smov 16   ;;  %vm792_vm6 = vcmask 261248   ;;  %vm909_vm7 = vcmask 392448  }
  0x7d   : > { %v559_v36 = vunpack.c.0.s8 %v558_v35  ;;  %s1678_s23 = smov 48   ;;  %s1204_s10 = sshll.u32 %s1880_s20, 3  ;;  %vm1026_vm8 = vcmask 523648  }
  0x7e   : > { %s1991_s14 = scalar_lea.vmem [#allocation12], %s1204_s10  ;;  %s1223_s17 = sshll.u32 %s1653_s27, 7 }
  0x7f   : > { %1251 = vmatpush3.bf16.msra.mxu0 %v1417_v2  ;;  %1259 = vmatpush3.bf16.msra.mxu1 %v1419_v4  ;;  %vm1949_vm4 = vcmp.ne.s32.totalorder %v559_v36, 0  ;;  %s1043_s3 = sshll.u32 %s1991_s14, 4  ;;  %s2005_s21 = scalar_lea.hbm %s2055_s7, %s1223_s17  ;;  %s1044_s3 = int_to_ptr.vmem [resolvable:$true] %s1043_s3 }
  0x80   : > { %1264 = vmatprep.subr.bf16.mxu0 %v1670_v0  ;;  %1270 = vmatprep.subr.bf16.mxu1 %v1670_v0  ;;  %s1029_s18 = scalar_lea.sflag [#allocation5], %s1880_s20  ;;  %s1573_s24 = scalar_lea.vmem %s1044_s3, 128 }
  0x81   : > { %p1574_p3 = scmp.ne.s32.totalorder %s1044_s3, %s1573_s24  ;;  %p2098_p9 = scmp.ne.s32.totalorder %s2083_s22, 0 }
  0x82   : > { %1253 = vmatmul.mubr.msk.bf16.vlgmr.msra.gmra.mxu0 %vm443_vm1, %v419_v5  ;;  %1261 = vmatmul.mubr.msk.bf16.vlgmr.msra.gmra.mxu1 %vm443_vm1, %v489_v6  ;;  %s1679_s30 = smov [#allocation12]  }
  0x83   : > { %1266 = vmatprep.mubr.msk.bf16.mxu0 %vm1671_vm0, %v1670_v0  ;;  %1272 = vmatprep.mubr.msk.bf16.mxu1 %vm1671_vm0, %v1670_v0  ;;  %p1575_p0 = pnand %p1574_p3, %p2098_p9  ;;  %s1577_s9 = sshll.u32 %s1679_s30, 4  ;;  %s1578_s9 = int_to_ptr.vmem [resolvable:$false] %s1577_s9 }
  0x84   : > { %s1579_s27 = scalar_lea.vmem %s1578_s9, 256  ;;  %p1580_p10 = scmp.lt.s32.totalorder %s1044_s3, %s1578_s9 }
  0x85   : > { %p1576_p7 = pneg %p1575_p0  ;;  %p1581_p13 = scmp.lt.s32.totalorder %s1579_s27, %s1573_s24 }
  0x87   : > { %p1582_p5 = por %p1581_p13, %p1580_p10 }
  0x89   : > { %p1583_p1 = pnand %p1582_p5, %p1576_p7 }
 0x142   : > { %v481_v8 = vpop.f32.mrf.mxu0  ;;  %v551_v12 = vpop.f32.mrf.mxu1 }
 0x143   : > { %v482_v9 = vadd.f32 %v1205_v7, %v481_v8  ;;  %v552_v19 = vadd.f32 %v1209_v17, %v551_v12 }
 0x144   : > { %v1254_v10 = vpop.f32.mrf.mxu0  ;;  %v1262_v14 = vpop.f32.mrf.mxu1 }
 0x145   : > { %v487_v11 = vpack.c.bf16 %v482_v9, %v482_v9  ;;  %v557_v23 = vpack.c.bf16 %v552_v19, %v552_v19 }
 0x146   : > { %v484_v13 = vpop.f32.mrf.mxu0  ;;  %v554_v16 = vpop.f32.mrf.mxu1 }
 0x147   : > { %488 = vst [vmem:[#allocation2] sm:$0xf] %v487_v11 }
 0x148   : > { %v1255_v15 = vpop.f32.mrf.mxu0  ;;  %v1263_v18 = vpop.f32.mrf.mxu1 }
 0x14e   : > { %v561_v20 = vld [vmem:[#allocation2] sm:$0xf] }
 0x14f   : > { %v567_v21 = vsel %vm562_vm2, %v561_v20, 0  ;;  %v1924_v22 = vcombine.low %v561_v20, %v561_v20 }
 0x150   : > { %1265 = vmatpush3.bf16.xpose.msra.mxu0 %v567_v21 }
 0x151   : > { %796 = vrot.lane.b32.xlu1 %v1924_v22, %s1672_s13  ;;  %679 = vrot.lane.b32.xlu0 %v1924_v22, %s1673_s26 }
 0x152   : > { %1276 = vmatprep.subr.bf16.mxu0 %v1670_v0 }
 0x155   : > { %794 = vrot.lane.b32.xlu1 %v557_v23, %s1672_s13  ;;  %677 = vrot.lane.b32.xlu0 %v557_v23, %s1673_s26 }
 0x157   : > { %1267 = vmatmul.mubr.msk.bf16.vlgmr.msra.gmra.mxu0 %vm562_vm2, %v557_v23 }
 0x158   : > { %1278 = vmatprep.mubr.msk.bf16.mxu0 %vm1671_vm0, %v1670_v0 }
 0x159   : > { %911 = vrot.lane.b32.xlu1 %v557_v23, %s1674_s29  ;;  %913 = vrot.lane.b32.xlu0 %v1924_v22, %s1674_s29 }
 0x15d   : > { %624 = vrot.lane.b32.xlu1 %v1924_v22, %s1675_s15 }
 0x1c3   : > { %v797_v24 = vpop.permute.xlu1 %796  ;;  %v680_v25 = vpop.permute.xlu0 %679 }
 0x1c4   : > { %v685_v26 = vsel %vm562_vm2, %v680_v25, 0  ;;  %v802_v30 = vsel %vm562_vm2, %v797_v24, 0 }
 0x1c5   : > { %1277 = vmatpush3.bf16.xpose.msra.mxu0 %v685_v26 }
 0x1c6   : > { %1288 = vmatprep.subr.bf16.mxu0 %v1670_v0 }
 0x1c7   : > { %v795_v27 = vpop.permute.xlu1 %794  ;;  %v678_v28 = vpop.permute.xlu0 %677 }
 0x1cb   : > { %v912_v29 = vpop.permute.xlu1 %911  ;;  %v914_v33 = vpop.permute.xlu0 %913 }
 0x1cc   : > { %1279 = vmatmul.mubr.msk.bf16.vlgmr.msra.gmra.mxu0 %vm562_vm2, %v678_v28  ;;  %v919_v34 = vsel %vm562_vm2, %v914_v33, 0 }
 0x1cd   : > { %1289 = vmatpush3.bf16.xpose.msra.mxu0 %v802_v30  ;;  %1290 = vmatprep.mubr.msk.bf16.mxu0 %vm1671_vm0, %v1670_v0 }
 0x1ce   : > { %1300 = vmatprep.subr.bf16.mxu0 %v1670_v0 }
 0x1cf   : > { %v625_v31 = vpop.permute.xlu1 %624 }
 0x1d0   : > { %v631_v32 = vsel %vm629_vm3, %v625_v31, 0 }
 0x1d1   : > { %1271 = vmatpush3.bf16.msra.mxu1 %v631_v32 }
 0x1d2   : > { %1282 = vmatprep.subr.bf16.mxu1 %v1670_v0 }
 0x1d4   : > { %1291 = vmatmul.mubr.msk.bf16.vlgmr.msra.gmra.mxu0 %vm562_vm2, %v795_v27 }
 0x1d5   : > { %1301 = vmatpush3.bf16.xpose.msra.mxu0 %v919_v34  ;;  %1302 = vmatprep.mubr.msk.bf16.mxu0 %vm1671_vm0, %v1670_v0 }
 0x1dc   : > { %1303 = vmatmul.mubr.msk.bf16.vlgmr.msra.gmra.mxu0 %vm562_vm2, %v912_v29 }
 0x217   : > { %v603_v38 = vpop.f32.mrf.mxu0 }
 0x218   : > { %v609_v39 = vsel %vm1949_vm4, -1e+09, %v603_v38 }
 0x219   : > { %v1268_v40 = vpop.f32.mrf.mxu0  ;;  %v611_v41 = vsel %vm610_vm5, %v609_v39, -inf }
 0x21a   : > { %612 = vmax.xlane.f32.xlu0 %v611_v41 }
 0x21b   : > { %v606_v42 = vpop.f32.mrf.mxu0 }
 0x21d   : > { %v1269_v43 = vpop.f32.mrf.mxu0 }
 0x28c   : > { %v721_v44 = vpop.f32.mrf.mxu0 }
 0x28d   : > { %v727_v45 = vsel %vm1949_vm4, -1e+09, %v721_v44 }
 0x28e   : > { %v1280_v46 = vpop.f32.mrf.mxu0  ;;  %v728_v47 = vsel %vm610_vm5, %v727_v45, -inf }
 0x28f   : > { %729 = vmax.xlane.f32.xlu1 %v728_v47 }
 0x290   : > { %v724_v48 = vpop.f32.mrf.mxu0 }
 0x292   : > { %v1281_v49 = vpop.f32.mrf.mxu0 }
 0x294   : > { %v838_v50 = vpop.f32.mrf.mxu0 }
 0x295   : > { %v844_v51 = vsel %vm1949_vm4, -1e+09, %v838_v50 }
 0x296   : > { %v1292_v52 = vpop.f32.mrf.mxu0  ;;  %v845_v53 = vsel %vm610_vm5, %v844_v51, -inf }
 0x297   : > { %846 = vmax.xlane.f32.xlu0 %v845_v53 }
 0x298   : > { %v841_v54 = vpop.f32.mrf.mxu0 }
 0x29a   : > { %v1293_v55 = vpop.f32.mrf.mxu0 }
 0x29c   : > { %v955_v56 = vpop.f32.mrf.mxu0 }
 0x29d   : > { %v961_v57 = vsel %vm1949_vm4, -1e+09, %v955_v56 }
 0x29e   : > { %v1304_v58 = vpop.f32.mrf.mxu0  ;;  %v962_v59 = vsel %vm610_vm5, %v961_v57, -inf }
 0x29f   : > { %963 = vmax.xlane.f32.xlu0 %v962_v59 }
 0x2a0   : > { %855 = vrot.lane.b32.xlu1 %v1924_v22, %s1676_s16  ;;  %v958_v60 = vpop.f32.mrf.mxu0 }
 0x2a2   : > { %v1305_v61 = vpop.f32.mrf.mxu0 }
 0x2a3   : > { %v613_v62 = vpop.xlane.xlu0 %612 }
 0x2a4   : > { %v614_v63 = vsub.f32 %v609_v39, %v613_v62  ;;  %972 = vrot.lane.b32.xlu1 %v1924_v22, %s1677_s1 }
 0x2a6   : > { %v615_v1 = vmul.f32 1.442695, %v614_v63 }
 0x2a8   : > { %1421 = vpow2.f32 %v615_v1 }
 0x2b5   : > { %v1422_v2 = vpop.eup %1421  ;;  %738 = vrot.lane.b32.xlu0 %v1924_v22, %s1678_s23 }
 0x2b6   : > { %v620_v3 = vpack.c.bf16 %v1422_v2, %v1422_v2  ;;  %v617_v27 = vsel %vm610_vm5, %v1422_v2, 0.0 }
 0x2b8   : > { %1273 = vmatmul.mubr.msk.bf16.vlgmr.msra.gmra.mxu1 %vm610_vm5, %v620_v3 }
 0x2b9   : > { %1284 = vmatprep.mubr.msk.bf16.mxu1 %vm1671_vm0, %v1670_v0 }
 0x318   : > { %v730_v4 = vpop.xlane.xlu1 %729 }
 0x319   : > { %v731_v5 = vsub.f32 %v727_v45, %v730_v4 }
 0x31b   : > { %v732_v6 = vmul.f32 1.442695, %v731_v5 }
 0x31c   : > { %v856_v17 = vpop.permute.xlu1 %855 }
 0x31d   : > { %1423 = vpow2.f32 %v732_v6  ;;  %v861_v19 = vsel %vm629_vm3, %v856_v17, 0 }
 0x320   : > { %v847_v7 = vpop.xlane.xlu0 %846  ;;  %v973_v22 = vpop.permute.xlu1 %972 }
 0x321   : > { %v848_v8 = vsub.f32 %v844_v51, %v847_v7  ;;  %v978_v24 = vsel %vm629_vm3, %v973_v22, 0 }
 0x323   : > { %v849_v9 = vmul.f32 1.442695, %v848_v8 }
 0x325   : > { %1425 = vpow2.f32 %v849_v9 }
 0x328   : > { %v964_v10 = vpop.xlane.xlu0 %963 }
 0x329   : > { %v965_v11 = vsub.f32 %v961_v57, %v964_v10 }
 0x32a   : > { %v1424_v12 = vpop.eup %1423 }
 0x32b   : > { %v966_v13 = vmul.f32 1.442695, %v965_v11  ;;  %v734_v14 = vsel %vm610_vm5, %v1424_v12, 0.0  ;;  %v737_v18 = vpack.c.bf16 %v1424_v12, %v1424_v12 }
 0x32c   : > { %735 = vadd.xlane.f32.xlu0 %v734_v14  ;;  %v739_v15 = vpop.permute.xlu0 %738 }
 0x32d   : > { %1427 = vpow2.f32 %v966_v13  ;;  %v744_v16 = vsel %vm629_vm3, %v739_v15, 0 }
 0x32e   : > { %1283 = vmatpush3.bf16.msra.mxu1 %v744_v16 }
 0x32f   : > { %1294 = vmatprep.subr.bf16.mxu1 %v1670_v0 }
 0x331   : > { %1285 = vmatmul.mubr.msk.bf16.vlgmr.msra.gmra.mxu1 %vm610_vm5, %v737_v18 }
 0x332   : > { %v1426_v20 = vpop.eup %1425  ;;  %1295 = vmatpush3.bf16.msra.mxu1 %v861_v19  ;;  %1296 = vmatprep.mubr.msk.bf16.mxu1 %vm1671_vm0, %v1670_v0 }
 0x333   : > { %v851_v21 = vsel %vm610_vm5, %v1426_v20, 0.0  ;;  %1306 = vmatprep.subr.bf16.mxu1 %v1670_v0  ;;  %v854_v23 = vpack.c.bf16 %v1426_v20, %v1426_v20 }
 0x334   : > { %852 = vadd.xlane.f32.xlu1 %v851_v21 }
 0x339   : > { %1297 = vmatmul.mubr.msk.bf16.vlgmr.msra.gmra.mxu1 %vm610_vm5, %v854_v23 }
 0x33a   : > { %v1428_v25 = vpop.eup %1427  ;;  %1307 = vmatpush3.bf16.msra.mxu1 %v978_v24  ;;  %1308 = vmatprep.mubr.msk.bf16.mxu1 %vm1671_vm0, %v1670_v0 }
 0x33b   : > { %v968_v26 = vsel %vm610_vm5, %v1428_v25, 0.0  ;;  %v971_v28 = vpack.c.bf16 %v1428_v25, %v1428_v25 }
 0x33c   : > { %969 = vadd.xlane.f32.xlu0 %v968_v26 }
 0x340   : > { %618 = vadd.xlane.f32.xlu0 %v617_v27 }
 0x341   : > { %1309 = vmatmul.mubr.msk.bf16.vlgmr.msra.gmra.mxu1 %vm610_vm5, %v971_v28 }
 0x378   : > { %v667_v29 = vpop.f32.mrf.mxu1 }
 0x37a   : > { %v1274_v30 = vpop.f32.mrf.mxu1 }
 0x37c   : > { %v670_v31 = vpop.f32.mrf.mxu1 }
 0x37e   : > { %v1275_v32 = vpop.f32.mrf.mxu1 }
 0x3b5   : > { %v736_v33 = vpop.xlane.xlu0 %735 }
 0x3bd   : > { %v853_v37 = vpop.xlane.xlu1 %852 }
 0x3c5   : > { %v970_v34 = vpop.xlane.xlu0 %969 }
 0x3c9   : > { %v619_v35 = vpop.xlane.xlu0 %618 }
 0x3ca   : > { %1429 = vrcp.f32 %v619_v35 }
 0x3cb   : > { %1431 = vrcp.f32 %v736_v33 }
 0x3cc   : > { %1433 = vrcp.f32 %v853_v37 }
 0x3cd   : > { %1435 = vrcp.f32 %v970_v34 }
 0x3d7   : > { %v1430_v36 = vpop.eup %1429 }
 0x3d8   : > { %v674_v0 = vmul.f32 %v1430_v36, %v667_v29  ;;  %v1432_v38 = vpop.eup %1431 }
 0x3d9   : > { %v1434_v44 = vpop.eup %1433 }
 0x3da   : > { %675 = vst.msk [vmem:[%s1991_s14] sm:$0xff] %vm562_vm2, %v674_v0  ;;  %v1436_v50 = vpop.eup %1435 }
 0x3f1   : > { %v780_v39 = vpop.f32.mrf.mxu1 }
 0x3f2   : > { %v787_v40 = vmul.f32 %v1432_v38, %v780_v39 }
 0x3f3   : > { %v1286_v41 = vpop.f32.mrf.mxu1 }
 0x3f4   : > { %789 = vrot.lane.b32.xlu1 %v787_v40, %s1677_s1 }
 0x3f5   : > { %v783_v42 = vpop.f32.mrf.mxu1 }
 0x3f7   : > { %v1287_v43 = vpop.f32.mrf.mxu1 }
 0x3f9   : > { %v897_v45 = vpop.f32.mrf.mxu1 }
 0x3fa   : > { %v904_v46 = vmul.f32 %v1434_v44, %v897_v45 }
 0x3fb   : > { %v1298_v47 = vpop.f32.mrf.mxu1 }
 0x3fc   : > { %906 = vrot.lane.b32.xlu0 %v904_v46, %s1676_s16 }
 0x3fd   : > { %v900_v48 = vpop.f32.mrf.mxu1 }
 0x3ff   : > { %v1299_v49 = vpop.f32.mrf.mxu1 }
 0x401   : > { %v1014_v51 = vpop.f32.mrf.mxu1 }
 0x402   : > { %v1021_v52 = vmul.f32 %v1436_v50, %v1014_v51 }
 0x403   : > { %v1310_v53 = vpop.f32.mrf.mxu1 }
 0x404   : > { %1023 = vrot.lane.b32.xlu1 %v1021_v52, %s1678_s23 }
 0x405   : > { %v1017_v54 = vpop.f32.mrf.mxu1 }
 0x407   : > { %v1311_v55 = vpop.f32.mrf.mxu1 }
 0x466   : > { %v790_v56 = vpop.permute.xlu1 %789 }
 0x467   : > { %793 = vst.msk [vmem:[%s1991_s14] sm:$0xff] %vm792_vm6, %v790_v56 }
 0x46e   : > { %v907_v57 = vpop.permute.xlu0 %906 }
 0x46f   : > { %910 = vst.msk [vmem:[%s1991_s14] sm:$0xff] %vm909_vm7, %v907_v57 }
 0x476   : > { %v1024_v58 = vpop.permute.xlu1 %1023 }
 0x477   : > { %1027 = vst.msk [vmem:[%s1991_s14] sm:$0xff] %vm1026_vm8, %v1024_v58 }
 0x478   : > { %1586 = shalt.err (!%p1583_p1)
}
 0x479   : > { %s1587_s8 = scalar_lea.hbm %s2005_s21, 128  ;;  %s1591_s13 = scalar_lea.hbm %s2055_s7, 256 }
 0x47a   : > { %p1588_p4 = scmp.ne.s32.totalorder %s2005_s21, %s1587_s8  ;;  %p1592_p11 = scmp.lt.s32.totalorder %s2005_s21, %s2055_s7 }
 0x47b   : > { %p1593_p2 = scmp.lt.s32.totalorder %s1591_s13, %s1587_s8 }
 0x47c   : > { %p1589_p6 = pnand %p1588_p4, %p2098_p9 }
 0x47d   : > { %p1594_p12 = por %p1593_p2, %p1592_p11 }
 0x47e   : > { %p1590_p8 = pneg %p1589_p6 }
 0x480   : > { %p1595_p3 = pnand %p1594_p12, %p1590_p8 }
 0x482   : > { %1598 = shalt.err (!%p1595_p3)
}
 0x483   : > { %1326 = dma.vmem_to_hbm [thread:$0]  (%p2098_p9), %s1044_s3, 128, %s2005_s21, %s1029_s18  }
 0x484 PF: > { %s2099_s15 = sld [smem:[#allocation17_spill]] }
 0x485   : > { %s2100_s16 = sld [smem:[#allocation20_spill]] }
 0x486   : > { %s2101_s1 = sld [smem:[#allocation19_spill]] }
 0x48a   : > { %s1055_s23 = sand.u32 1, %s2099_s15  }
 0x48b   : > { %p2102_p0 = scmp.ne.s32.totalorder %s2100_s16, 0  ;;  %s1056_s10 = scalar_lea.sflag [#allocation5], %s1055_s23 }
 0x48c   : > { %p2103_p7 = scmp.ge.s32.totalorder %s2101_s1, 2 }
 0x48e   : > { %p1346_p10 = pnand %p2103_p7, %p2102_p0 }
 0x490   : > { %p1347_p13 = pneg %p1346_p10 }
 0x492   : > { %1636 = dma.done.wait (%p1347_p13), %s1056_s10, 128  }
 0x493   : > { %1638 = vsyncadd (%p1347_p13), %s1056_s10, 4294967168  ;;  %s27_s29 = sadd.s32 1, %s2101_s1   ;;  %s2104_s14 = sld [smem:[#allocation18_spill]] }
 0x494   : > { %p24_p5 = scmp.ge.s32.totalorder %s27_s29, 4   ;;  %s2105_s26 = sld [smem:[#allocation22_spill]] }
 0x495   : > { %s2106_s22 = sld [smem:[#allocation21_spill]]  ;;  %s2107_s24 = smov %s1645_s25 }
 0x496   : > { %s2109_s27 = smov %s1657_s28 }
 0x497   :  { %26 = sbr.rel (!%p24_p5) target bundleno = 12 (0xc), region = 129 }
 0x499   : > { %s2108_s25 = smov %s2104_s14 }
 0x49b   : > { %s2110_s28 = smov %s2106_s22 }
 0x49c   :  { %1061 = vsyncpa [#allocation4], 1 }
 0x49d   :  { %1063 = vsyncpa [#allocation4 + $0x1], 1 }
 0x49e   :  { %1064 = vsyncpa [#allocation7], 1 }
 0x49f   :  { %1066 = vsyncpa [#allocation7 + $0x1], 1 }
 0x4a0   :  { %1067 = vsyncpa [#allocation10], 1 }
 0x4a1   :  { %1068 = vsyncpa [#allocation5], 1 }
 0x4a2   :  { %1070 = vsyncpa [#allocation5 + $0x1], 1 }

</bundles_post_ra>
